<compile_context>
chip_gen: v7x
topology: tpu7x:2x2x1
jax: 0.10.0
libtpu: 0.0.40
codegen_flags: <defaults>
</compile_context>

<pallas_src>
import math

import jax
import jax.numpy as jnp
import numpy as np
from jax.experimental import pallas as pl
from jax.experimental.pallas import tpu as pltpu


# ----------------------------------------------------------------------------
# Wrapper + Pallas kernel
# ----------------------------------------------------------------------------
def my_ts_conv_decoder(code_x, code_t, kernel_params):
    """code_x: [N, L, 3], code_t: [N, L, Dim]  ->  [N, nChannels, L].

    kernel_params: list of (w, b) per layer with
        w: (K*Cin, Cout) im2col weight (tap index = cross-correlation index),
        b: (1, Cout).
    """
    N, L, _ = code_x.shape
    # torch.cat((code_x.permute(0,2,1), code_t.permute(0,2,1)), dim=1) in NLC:
    x = jnp.concatenate([code_x, code_t], axis=-1).astype(jnp.float32)  # (N,L,C)
    cin0 = x.shape[-1]
    x_flat = x.reshape(N * L, cin0)                                     # (N*L,C)
    NL = N * L
    n_ch = kernel_params[-1][0].shape[-1]

    flat_params = []
    for w, b in kernel_params:
        flat_params += [w, b]

    def decoder_kernel(x_ref, *refs):
        out_ref = refs[-1]
        p_refs = refs[:-1]

        # position within each sample (for boundary masking of rolled taps)
        t = jax.lax.broadcasted_iota(jnp.int32, (NL, 1), 0) % L
        mask_cache = {}

        def mask_for(d):
            # rows whose tap x[t + d] falls outside [0, L) must be zeroed; this
            # also zeroes the rows that `roll` pulled from a neighboring sample.
            if d not in mask_cache:
                td = t + d
                mask_cache[d] = jnp.logical_and(td >= 0, td < L)
            return mask_cache[d]

        def conv_transpose(y, w_ref, b_ref):
            cin = y.shape[1]
            kcin, _ = w_ref.shape
            K = kcin // cin
            pad = (K - 1) // 2
            taps = []
            for k in range(K):
                d = k - pad                       # tap offset in [-pad, pad]
                if d == 0:
                    taps.append(y)
                else:
                    # rolled[r] = y[(r + d) mod NL]  (XLU rotate, no relayout copy)
                    rolled = pltpu.roll(y, (-d) % NL, 0)
                    taps.append(jnp.where(mask_for(d), rolled, 0.0))
            col = jnp.concatenate(taps, axis=1)   # (NL, K*cin) im2col slab
            out = jnp.dot(col, w_ref[...], preferred_element_type=jnp.float32)
            return out + b_ref[...]               # bias broadcast on the VPU

        y = x_ref[...]
        for i in range(0, len(p_refs), 2):        # 5 layers, ReLU after each
            y = jnp.maximum(conv_transpose(y, p_refs[i], p_refs[i + 1]), 0.0)
        out_ref[...] = y                          # single full-slab store

    flops = sum(2 * NL * w.shape[0] * w.shape[1] for w, _ in kernel_params)
    bytes_accessed = 4 * (x_flat.size
                          + sum(w.size + b.size for w, b in kernel_params)
                          + NL * n_ch)

    # Gridless single invocation: the whole problem (a few hundred KiB of fp32)
    # fits VMEM on v5e/v6e/v7x.  For large N*L, tile L with a halo of 6 and a
    # ("parallel",) grid to use both v7x TensorCores.
    out_flat = pl.pallas_call(
        decoder_kernel,
        out_shape=jax.ShapeDtypeStruct((NL, n_ch), jnp.float32),
        in_specs=[pl.BlockSpec(memory_space=pltpu.MemorySpace.VMEM)]
                 * (1 + len(flat_params)),
        out_specs=pl.BlockSpec(memory_space=pltpu.MemorySpace.VMEM),
        compiler_params=pltpu.CompilerParams(vmem_limit_bytes=32 * 1024 * 1024),
        cost_estimate=pl.CostEstimate(flops=flops, transcendentals=0,
                                      bytes_accessed=bytes_accessed),
    )(x_flat, *flat_params)

    # PyTorch output layout [N, nChannels, L]
    return jnp.transpose(out_flat.reshape(N, L, n_ch), (0, 2, 1))


# ----------------------------------------------------------------------------
# Deterministic parameter init (shapes from MyTSConvDecoder.__init__)
# ----------------------------------------------------------------------------
def init_params(key, n_channels=1, dim=200):
    layer_cfg = [
        (3 + dim, 8, 3),    # dconv1: k=3, pad=1
        (8, 8, 13),         # dconv2: k=13, pad=6
        (8, 8, 3),          # dconv3: k=3, pad=1
        (8, 8, 5),          # dconv4: k=5, pad=2
        (8, n_channels, 3), # dconv5: k=3, pad=1
    ]
    torch_layout, kernel_layout = [], []
    keys = jax.random.split(key, len(layer_cfg))
    for (cin, cout, K), k_ in zip(layer_cfg, keys):
        kw, kb = jax.random.split(k_)
        bound = 1.0 / math.sqrt(cout * K)        # fan_in of ConvTranspose weight
        w_t = jax.random.uniform(kw, (cin, cout, K), jnp.float32, -bound, bound)
        b = jax.random.uniform(kb, (cout,), jnp.float32, -bound, bound)
        # spectral_norm (UseSN=False => applied): sigma of the (cin, cout*K) view
        sigma = float(np.linalg.svd(np.asarray(w_t).reshape(cin, cout * K),
                                    compute_uv=False)[0])
        w_t = w_t / sigma
        torch_layout.append((w_t, b))
        # kernel layout: flip taps + swap channels, then flatten to (K*cin, cout)
        w_k = jnp.transpose(w_t, (2, 0, 1))[::-1].reshape(K * cin, cout)
        kernel_layout.append((w_k, b.reshape(1, cout)))
    return {"torch": torch_layout, "kernel": kernel_layout}


# ----------------------------------------------------------------------------
# Independent NumPy reference (literal ConvTranspose1d definition)
# ----------------------------------------------------------------------------
def _conv_transpose1d_np(x, w, b):
    # x: (N, Cin, L); w: (Cin, Cout, K) PyTorch layout; pad = (K-1)//2 => Lout = L
    _, _, L = x.shape
    _, cout, K = w.shape
    pad = (K - 1) // 2
    y = np.zeros((x.shape[0], cout, L), np.float64)
    for k in range(K):
        for i in range(L):
            j = i + k - pad
            if 0 <= j < L:
                y[:, :, j] += x[:, :, i] @ w[:, :, k]
    return y + b.reshape(1, -1, 1)


def ref_forward(code_x, code_t, torch_params):
    x = np.concatenate([np.transpose(code_x, (0, 2, 1)),
                        np.transpose(code_t, (0, 2, 1))], axis=1).astype(np.float64)
    for w, b in torch_params:
        x = _conv_transpose1d_np(x, np.asarray(w, np.float64),
                                 np.asarray(b, np.float64))
        x = np.maximum(x, 0.0)
    return x


if __name__ == "__main__":
    key = jax.random.PRNGKey(0)
    kx, kt, kp = jax.random.split(key, 3)

    N, L, DIM, NCH = 2, 16, 32, 1
    code_x = jax.random.normal(kx, (N, L, 3), jnp.float32)
    code_t = jax.random.normal(kt, (N, L, DIM), jnp.float32)
    params = init_params(kp, n_channels=NCH, dim=DIM)

    out = my_ts_conv_decoder(code_x, code_t, params["kernel"])
    out = jax.block_until_ready(out)

    ref = ref_forward(np.asarray(code_x), np.asarray(code_t), params["torch"])
    np.testing.assert_allclose(np.asarray(out), ref, rtol=2e-4, atol=2e-4)
    assert out.shape == (N, NCH, L)
    print("KERNEL_OK")
</pallas_src>

<mosaic_0001>
module attributes {stable_mosaic.version = 11 : i64} {
  func.func @decoder_kernel(%arg0: memref<32x35xf32, #tpu.memory_space<vmem>>, %arg1: memref<105x8xf32, #tpu.memory_space<vmem>>, %arg2: memref<1x8xf32, #tpu.memory_space<vmem>>, %arg3: memref<104x8xf32, #tpu.memory_space<vmem>>, %arg4: memref<1x8xf32, #tpu.memory_space<vmem>>, %arg5: memref<24x8xf32, #tpu.memory_space<vmem>>, %arg6: memref<1x8xf32, #tpu.memory_space<vmem>>, %arg7: memref<40x8xf32, #tpu.memory_space<vmem>>, %arg8: memref<1x8xf32, #tpu.memory_space<vmem>>, %arg9: memref<24x1xf32, #tpu.memory_space<vmem>>, %arg10: memref<1x1xf32, #tpu.memory_space<vmem>>, %arg11: memref<32x1xf32, #tpu.memory_space<vmem>>) attributes {dimension_semantics = [], scalar_prefetch = 0 : i64, scratch_operands = 0 : i64, tpu.core_type = #tpu.core_type<tc>} {
    %0 = tpu.iota {dimensions = array<i32: 0>} : vector<32x1xi32>
    %c16_i32 = arith.constant 16 : i32
    %c0_i32 = arith.constant 0 : i32
    %1 = arith.cmpi eq, %c16_i32, %c0_i32 : i32
    %c1_i32 = arith.constant 1 : i32
    %2 = arith.select %1, %c1_i32, %c16_i32 : i32
    %3 = vector.broadcast %2 : i32 to vector<32x1xi32>
    %4 = arith.remsi %0, %3 : vector<32x1xi32>
    %c0_i32_0 = arith.constant 0 : i32
    %5 = vector.broadcast %c0_i32_0 : i32 to vector<32x1xi32>
    %6 = arith.cmpi ne, %4, %5 : vector<32x1xi32>
    %c0_i32_1 = arith.constant 0 : i32
    %7 = vector.broadcast %c0_i32_1 : i32 to vector<32x1xi32>
    %8 = arith.cmpi slt, %4, %7 : vector<32x1xi32>
    %c0_i32_2 = arith.constant 0 : i32
    %9 = arith.cmpi slt, %2, %c0_i32_2 : i32
    %10 = vector.broadcast %9 : i1 to vector<32x1xi1>
    %11 = vector.broadcast %10 : vector<32x1xi1> to vector<32x1xi1>
    %12 = arith.xori %8, %11 : vector<32x1xi1>
    %13 = arith.andi %12, %6 : vector<32x1xi1>
    %14 = vector.broadcast %2 : i32 to vector<32x1xi32>
    %15 = arith.addi %4, %14 : vector<32x1xi32>
    %16 = arith.select %13, %15, %4 : vector<32x1xi1>, vector<32x1xi32>
    %c0 = arith.constant 0 : index
    %c0_3 = arith.constant 0 : index
    %17 = vector.load %arg0[%c0, %c0_3] : memref<32x35xf32, #tpu.memory_space<vmem>>, vector<32x35xf32>
    %c1_i32_4 = arith.constant 1 : i32
    %18 = tpu.dynamic_rotate %17 by %c1_i32_4 dim 0 : vector<32x35xf32>, i32 -> vector<32x35xf32>
    %c-1_i32 = arith.constant -1 : i32
    %19 = vector.broadcast %c-1_i32 : i32 to vector<32x1xi32>
    %20 = arith.addi %16, %19 : vector<32x1xi32>
    %c0_i32_5 = arith.constant 0 : i32
    %21 = vector.broadcast %c0_i32_5 : i32 to vector<32x1xi32>
    %22 = arith.cmpi sge, %20, %21 : vector<32x1xi32>
    %c16_i32_6 = arith.constant 16 : i32
    %23 = vector.broadcast %c16_i32_6 : i32 to vector<32x1xi32>
    %24 = arith.cmpi slt, %20, %23 : vector<32x1xi32>
    %25 = arith.andi %22, %24 : vector<32x1xi1>
    %cst = arith.constant 0.000000e+00 : f32
    %26 = vector.shape_cast %25 : vector<32x1xi1> to vector<32x1xi1>
    %27 = vector.broadcast %26 : vector<32x1xi1> to vector<32x35xi1>
    %28 = vector.broadcast %cst : f32 to vector<32x35xf32>
    %29 = arith.select %27, %18, %28 : vector<32x35xi1>, vector<32x35xf32>
    %c31_i32 = arith.constant 31 : i32
    %30 = tpu.dynamic_rotate %17 by %c31_i32 dim 0 : vector<32x35xf32>, i32 -> vector<32x35xf32>
    %c1_i32_7 = arith.constant 1 : i32
    %31 = vector.broadcast %c1_i32_7 : i32 to vector<32x1xi32>
    %32 = arith.addi %16, %31 : vector<32x1xi32>
    %c0_i32_8 = arith.constant 0 : i32
    %33 = vector.broadcast %c0_i32_8 : i32 to vector<32x1xi32>
    %34 = arith.cmpi sge, %32, %33 : vector<32x1xi32>
    %c16_i32_9 = arith.constant 16 : i32
    %35 = vector.broadcast %c16_i32_9 : i32 to vector<32x1xi32>
    %36 = arith.cmpi slt, %32, %35 : vector<32x1xi32>
    %37 = arith.andi %34, %36 : vector<32x1xi1>
    %cst_10 = arith.constant 0.000000e+00 : f32
    %38 = vector.shape_cast %37 : vector<32x1xi1> to vector<32x1xi1>
    %39 = vector.broadcast %38 : vector<32x1xi1> to vector<32x35xi1>
    %40 = vector.broadcast %cst_10 : f32 to vector<32x35xf32>
    %41 = arith.select %39, %30, %40 : vector<32x35xi1>, vector<32x35xf32>
    %42 = tpu.concatenate %29, %17, %41 in 1 : vector<32x35xf32>, vector<32x35xf32>, vector<32x35xf32> -> vector<32x105xf32>
    %c0_11 = arith.constant 0 : index
    %c0_12 = arith.constant 0 : index
    %43 = vector.load %arg1[%c0_11, %c0_12] : memref<105x8xf32, #tpu.memory_space<vmem>>, vector<105x8xf32>
    %cst_13 = arith.constant dense<0.000000e+00> : vector<32x8xf32>
    %44 = tpu.matmul %42, %43, %cst_13 {dimension_numbers = #tpu.dot_dimension_numbers<[1], [0], [0], [1], [0, 0, 1, 1], [], []>} : vector<32x105xf32>, vector<105x8xf32>, vector<32x8xf32> -> vector<32x8xf32>
    %c0_14 = arith.constant 0 : index
    %c0_15 = arith.constant 0 : index
    %45 = vector.load %arg2[%c0_14, %c0_15] : memref<1x8xf32, #tpu.memory_space<vmem>>, vector<1x8xf32>
    %46 = vector.broadcast %45 : vector<1x8xf32> to vector<32x8xf32>
    %47 = arith.addf %44, %46 : vector<32x8xf32>
    %cst_16 = arith.constant 0.000000e+00 : f32
    %48 = vector.broadcast %cst_16 : f32 to vector<32x8xf32>
    %49 = arith.maximumf %47, %48 : vector<32x8xf32>
    %c6_i32 = arith.constant 6 : i32
    %50 = tpu.dynamic_rotate %49 by %c6_i32 dim 0 : vector<32x8xf32>, i32 -> vector<32x8xf32>
    %c-6_i32 = arith.constant -6 : i32
    %51 = vector.broadcast %c-6_i32 : i32 to vector<32x1xi32>
    %52 = arith.addi %16, %51 : vector<32x1xi32>
    %c0_i32_17 = arith.constant 0 : i32
    %53 = vector.broadcast %c0_i32_17 : i32 to vector<32x1xi32>
    %54 = arith.cmpi sge, %52, %53 : vector<32x1xi32>
    %c16_i32_18 = arith.constant 16 : i32
    %55 = vector.broadcast %c16_i32_18 : i32 to vector<32x1xi32>
    %56 = arith.cmpi slt, %52, %55 : vector<32x1xi32>
    %57 = arith.andi %54, %56 : vector<32x1xi1>
    %cst_19 = arith.constant 0.000000e+00 : f32
    %58 = vector.shape_cast %57 : vector<32x1xi1> to vector<32x1xi1>
    %59 = vector.broadcast %58 : vector<32x1xi1> to vector<32x8xi1>
    %60 = vector.broadcast %cst_19 : f32 to vector<32x8xf32>
    %61 = arith.select %59, %50, %60 : vector<32x8xi1>, vector<32x8xf32>
    %c5_i32 = arith.constant 5 : i32
    %62 = tpu.dynamic_rotate %49 by %c5_i32 dim 0 : vector<32x8xf32>, i32 -> vector<32x8xf32>
    %c-5_i32 = arith.constant -5 : i32
    %63 = vector.broadcast %c-5_i32 : i32 to vector<32x1xi32>
    %64 = arith.addi %16, %63 : vector<32x1xi32>
    %c0_i32_20 = arith.constant 0 : i32
    %65 = vector.broadcast %c0_i32_20 : i32 to vector<32x1xi32>
    %66 = arith.cmpi sge, %64, %65 : vector<32x1xi32>
    %c16_i32_21 = arith.constant 16 : i32
    %67 = vector.broadcast %c16_i32_21 : i32 to vector<32x1xi32>
    %68 = arith.cmpi slt, %64, %67 : vector<32x1xi32>
    %69 = arith.andi %66, %68 : vector<32x1xi1>
    %cst_22 = arith.constant 0.000000e+00 : f32
    %70 = vector.shape_cast %69 : vector<32x1xi1> to vector<32x1xi1>
    %71 = vector.broadcast %70 : vector<32x1xi1> to vector<32x8xi1>
    %72 = vector.broadcast %cst_22 : f32 to vector<32x8xf32>
    %73 = arith.select %71, %62, %72 : vector<32x8xi1>, vector<32x8xf32>
    %c4_i32 = arith.constant 4 : i32
    %74 = tpu.dynamic_rotate %49 by %c4_i32 dim 0 : vector<32x8xf32>, i32 -> vector<32x8xf32>
    %c-4_i32 = arith.constant -4 : i32
    %75 = vector.broadcast %c-4_i32 : i32 to vector<32x1xi32>
    %76 = arith.addi %16, %75 : vector<32x1xi32>
    %c0_i32_23 = arith.constant 0 : i32
    %77 = vector.broadcast %c0_i32_23 : i32 to vector<32x1xi32>
    %78 = arith.cmpi sge, %76, %77 : vector<32x1xi32>
    %c16_i32_24 = arith.constant 16 : i32
    %79 = vector.broadcast %c16_i32_24 : i32 to vector<32x1xi32>
    %80 = arith.cmpi slt, %76, %79 : vector<32x1xi32>
    %81 = arith.andi %78, %80 : vector<32x1xi1>
    %cst_25 = arith.constant 0.000000e+00 : f32
    %82 = vector.shape_cast %81 : vector<32x1xi1> to vector<32x1xi1>
    %83 = vector.broadcast %82 : vector<32x1xi1> to vector<32x8xi1>
    %84 = vector.broadcast %cst_25 : f32 to vector<32x8xf32>
    %85 = arith.select %83, %74, %84 : vector<32x8xi1>, vector<32x8xf32>
    %c3_i32 = arith.constant 3 : i32
    %86 = tpu.dynamic_rotate %49 by %c3_i32 dim 0 : vector<32x8xf32>, i32 -> vector<32x8xf32>
    %c-3_i32 = arith.constant -3 : i32
    %87 = vector.broadcast %c-3_i32 : i32 to vector<32x1xi32>
    %88 = arith.addi %16, %87 : vector<32x1xi32>
    %c0_i32_26 = arith.constant 0 : i32
    %89 = vector.broadcast %c0_i32_26 : i32 to vector<32x1xi32>
    %90 = arith.cmpi sge, %88, %89 : vector<32x1xi32>
    %c16_i32_27 = arith.constant 16 : i32
    %91 = vector.broadcast %c16_i32_27 : i32 to vector<32x1xi32>
    %92 = arith.cmpi slt, %88, %91 : vector<32x1xi32>
    %93 = arith.andi %90, %92 : vector<32x1xi1>
    %cst_28 = arith.constant 0.000000e+00 : f32
    %94 = vector.shape_cast %93 : vector<32x1xi1> to vector<32x1xi1>
    %95 = vector.broadcast %94 : vector<32x1xi1> to vector<32x8xi1>
    %96 = vector.broadcast %cst_28 : f32 to vector<32x8xf32>
    %97 = arith.select %95, %86, %96 : vector<32x8xi1>, vector<32x8xf32>
    %c2_i32 = arith.constant 2 : i32
    %98 = tpu.dynamic_rotate %49 by %c2_i32 dim 0 : vector<32x8xf32>, i32 -> vector<32x8xf32>
    %c-2_i32 = arith.constant -2 : i32
    %99 = vector.broadcast %c-2_i32 : i32 to vector<32x1xi32>
    %100 = arith.addi %16, %99 : vector<32x1xi32>
    %c0_i32_29 = arith.constant 0 : i32
    %101 = vector.broadcast %c0_i32_29 : i32 to vector<32x1xi32>
    %102 = arith.cmpi sge, %100, %101 : vector<32x1xi32>
    %c16_i32_30 = arith.constant 16 : i32
    %103 = vector.broadcast %c16_i32_30 : i32 to vector<32x1xi32>
    %104 = arith.cmpi slt, %100, %103 : vector<32x1xi32>
    %105 = arith.andi %102, %104 : vector<32x1xi1>
    %cst_31 = arith.constant 0.000000e+00 : f32
    %106 = vector.shape_cast %105 : vector<32x1xi1> to vector<32x1xi1>
    %107 = vector.broadcast %106 : vector<32x1xi1> to vector<32x8xi1>
    %108 = vector.broadcast %cst_31 : f32 to vector<32x8xf32>
    %109 = arith.select %107, %98, %108 : vector<32x8xi1>, vector<32x8xf32>
    %c1_i32_32 = arith.constant 1 : i32
    %110 = tpu.dynamic_rotate %49 by %c1_i32_32 dim 0 : vector<32x8xf32>, i32 -> vector<32x8xf32>
    %cst_33 = arith.constant 0.000000e+00 : f32
    %111 = vector.shape_cast %25 : vector<32x1xi1> to vector<32x1xi1>
    %112 = vector.broadcast %111 : vector<32x1xi1> to vector<32x8xi1>
    %113 = vector.broadcast %cst_33 : f32 to vector<32x8xf32>
    %114 = arith.select %112, %110, %113 : vector<32x8xi1>, vector<32x8xf32>
    %c31_i32_34 = arith.constant 31 : i32
    %115 = tpu.dynamic_rotate %49 by %c31_i32_34 dim 0 : vector<32x8xf32>, i32 -> vector<32x8xf32>
    %cst_35 = arith.constant 0.000000e+00 : f32
    %116 = vector.shape_cast %37 : vector<32x1xi1> to vector<32x1xi1>
    %117 = vector.broadcast %116 : vector<32x1xi1> to vector<32x8xi1>
    %118 = vector.broadcast %cst_35 : f32 to vector<32x8xf32>
    %119 = arith.select %117, %115, %118 : vector<32x8xi1>, vector<32x8xf32>
    %c30_i32 = arith.constant 30 : i32
    %120 = tpu.dynamic_rotate %49 by %c30_i32 dim 0 : vector<32x8xf32>, i32 -> vector<32x8xf32>
    %c2_i32_36 = arith.constant 2 : i32
    %121 = vector.broadcast %c2_i32_36 : i32 to vector<32x1xi32>
    %122 = arith.addi %16, %121 : vector<32x1xi32>
    %c0_i32_37 = arith.constant 0 : i32
    %123 = vector.broadcast %c0_i32_37 : i32 to vector<32x1xi32>
    %124 = arith.cmpi sge, %122, %123 : vector<32x1xi32>
    %c16_i32_38 = arith.constant 16 : i32
    %125 = vector.broadcast %c16_i32_38 : i32 to vector<32x1xi32>
    %126 = arith.cmpi slt, %122, %125 : vector<32x1xi32>
    %127 = arith.andi %124, %126 : vector<32x1xi1>
    %cst_39 = arith.constant 0.000000e+00 : f32
    %128 = vector.shape_cast %127 : vector<32x1xi1> to vector<32x1xi1>
    %129 = vector.broadcast %128 : vector<32x1xi1> to vector<32x8xi1>
    %130 = vector.broadcast %cst_39 : f32 to vector<32x8xf32>
    %131 = arith.select %129, %120, %130 : vector<32x8xi1>, vector<32x8xf32>
    %c29_i32 = arith.constant 29 : i32
    %132 = tpu.dynamic_rotate %49 by %c29_i32 dim 0 : vector<32x8xf32>, i32 -> vector<32x8xf32>
    %c3_i32_40 = arith.constant 3 : i32
    %133 = vector.broadcast %c3_i32_40 : i32 to vector<32x1xi32>
    %134 = arith.addi %16, %133 : vector<32x1xi32>
    %c0_i32_41 = arith.constant 0 : i32
    %135 = vector.broadcast %c0_i32_41 : i32 to vector<32x1xi32>
    %136 = arith.cmpi sge, %134, %135 : vector<32x1xi32>
    %c16_i32_42 = arith.constant 16 : i32
    %137 = vector.broadcast %c16_i32_42 : i32 to vector<32x1xi32>
    %138 = arith.cmpi slt, %134, %137 : vector<32x1xi32>
    %139 = arith.andi %136, %138 : vector<32x1xi1>
    %cst_43 = arith.constant 0.000000e+00 : f32
    %140 = vector.shape_cast %139 : vector<32x1xi1> to vector<32x1xi1>
    %141 = vector.broadcast %140 : vector<32x1xi1> to vector<32x8xi1>
    %142 = vector.broadcast %cst_43 : f32 to vector<32x8xf32>
    %143 = arith.select %141, %132, %142 : vector<32x8xi1>, vector<32x8xf32>
    %c28_i32 = arith.constant 28 : i32
    %144 = tpu.dynamic_rotate %49 by %c28_i32 dim 0 : vector<32x8xf32>, i32 -> vector<32x8xf32>
    %c4_i32_44 = arith.constant 4 : i32
    %145 = vector.broadcast %c4_i32_44 : i32 to vector<32x1xi32>
    %146 = arith.addi %16, %145 : vector<32x1xi32>
    %c0_i32_45 = arith.constant 0 : i32
    %147 = vector.broadcast %c0_i32_45 : i32 to vector<32x1xi32>
    %148 = arith.cmpi sge, %146, %147 : vector<32x1xi32>
    %c16_i32_46 = arith.constant 16 : i32
    %149 = vector.broadcast %c16_i32_46 : i32 to vector<32x1xi32>
    %150 = arith.cmpi slt, %146, %149 : vector<32x1xi32>
    %151 = arith.andi %148, %150 : vector<32x1xi1>
    %cst_47 = arith.constant 0.000000e+00 : f32
    %152 = vector.shape_cast %151 : vector<32x1xi1> to vector<32x1xi1>
    %153 = vector.broadcast %152 : vector<32x1xi1> to vector<32x8xi1>
    %154 = vector.broadcast %cst_47 : f32 to vector<32x8xf32>
    %155 = arith.select %153, %144, %154 : vector<32x8xi1>, vector<32x8xf32>
    %c27_i32 = arith.constant 27 : i32
    %156 = tpu.dynamic_rotate %49 by %c27_i32 dim 0 : vector<32x8xf32>, i32 -> vector<32x8xf32>
    %c5_i32_48 = arith.constant 5 : i32
    %157 = vector.broadcast %c5_i32_48 : i32 to vector<32x1xi32>
    %158 = arith.addi %16, %157 : vector<32x1xi32>
    %c0_i32_49 = arith.constant 0 : i32
    %159 = vector.broadcast %c0_i32_49 : i32 to vector<32x1xi32>
    %160 = arith.cmpi sge, %158, %159 : vector<32x1xi32>
    %c16_i32_50 = arith.constant 16 : i32
    %161 = vector.broadcast %c16_i32_50 : i32 to vector<32x1xi32>
    %162 = arith.cmpi slt, %158, %161 : vector<32x1xi32>
    %163 = arith.andi %160, %162 : vector<32x1xi1>
    %cst_51 = arith.constant 0.000000e+00 : f32
    %164 = vector.shape_cast %163 : vector<32x1xi1> to vector<32x1xi1>
    %165 = vector.broadcast %164 : vector<32x1xi1> to vector<32x8xi1>
    %166 = vector.broadcast %cst_51 : f32 to vector<32x8xf32>
    %167 = arith.select %165, %156, %166 : vector<32x8xi1>, vector<32x8xf32>
    %c26_i32 = arith.constant 26 : i32
    %168 = tpu.dynamic_rotate %49 by %c26_i32 dim 0 : vector<32x8xf32>, i32 -> vector<32x8xf32>
    %c6_i32_52 = arith.constant 6 : i32
    %169 = vector.broadcast %c6_i32_52 : i32 to vector<32x1xi32>
    %170 = arith.addi %16, %169 : vector<32x1xi32>
    %c0_i32_53 = arith.constant 0 : i32
    %171 = vector.broadcast %c0_i32_53 : i32 to vector<32x1xi32>
    %172 = arith.cmpi sge, %170, %171 : vector<32x1xi32>
    %c16_i32_54 = arith.constant 16 : i32
    %173 = vector.broadcast %c16_i32_54 : i32 to vector<32x1xi32>
    %174 = arith.cmpi slt, %170, %173 : vector<32x1xi32>
    %175 = arith.andi %172, %174 : vector<32x1xi1>
    %cst_55 = arith.constant 0.000000e+00 : f32
    %176 = vector.shape_cast %175 : vector<32x1xi1> to vector<32x1xi1>
    %177 = vector.broadcast %176 : vector<32x1xi1> to vector<32x8xi1>
    %178 = vector.broadcast %cst_55 : f32 to vector<32x8xf32>
    %179 = arith.select %177, %168, %178 : vector<32x8xi1>, vector<32x8xf32>
    %180 = tpu.concatenate %61, %73, %85, %97, %109, %114, %49, %119, %131, %143, %155, %167, %179 in 1 : vector<32x8xf32>, vector<32x8xf32>, vector<32x8xf32>, vector<32x8xf32>, vector<32x8xf32>, vector<32x8xf32>, vector<32x8xf32>, vector<32x8xf32>, vector<32x8xf32>, vector<32x8xf32>, vector<32x8xf32>, vector<32x8xf32>, vector<32x8xf32> -> vector<32x104xf32>
    %c0_56 = arith.constant 0 : index
    %c0_57 = arith.constant 0 : index
    %181 = vector.load %arg3[%c0_56, %c0_57] : memref<104x8xf32, #tpu.memory_space<vmem>>, vector<104x8xf32>
    %cst_58 = arith.constant dense<0.000000e+00> : vector<32x8xf32>
    %182 = tpu.matmul %180, %181, %cst_58 {dimension_numbers = #tpu.dot_dimension_numbers<[1], [0], [0], [1], [0, 0, 1, 1], [], []>} : vector<32x104xf32>, vector<104x8xf32>, vector<32x8xf32> -> vector<32x8xf32>
    %c0_59 = arith.constant 0 : index
    %c0_60 = arith.constant 0 : index
    %183 = vector.load %arg4[%c0_59, %c0_60] : memref<1x8xf32, #tpu.memory_space<vmem>>, vector<1x8xf32>
    %184 = vector.broadcast %183 : vector<1x8xf32> to vector<32x8xf32>
    %185 = arith.addf %182, %184 : vector<32x8xf32>
    %cst_61 = arith.constant 0.000000e+00 : f32
    %186 = vector.broadcast %cst_61 : f32 to vector<32x8xf32>
    %187 = arith.maximumf %185, %186 : vector<32x8xf32>
    %c1_i32_62 = arith.constant 1 : i32
    %188 = tpu.dynamic_rotate %187 by %c1_i32_62 dim 0 : vector<32x8xf32>, i32 -> vector<32x8xf32>
    %cst_63 = arith.constant 0.000000e+00 : f32
    %189 = vector.shape_cast %25 : vector<32x1xi1> to vector<32x1xi1>
    %190 = vector.broadcast %189 : vector<32x1xi1> to vector<32x8xi1>
    %191 = vector.broadcast %cst_63 : f32 to vector<32x8xf32>
    %192 = arith.select %190, %188, %191 : vector<32x8xi1>, vector<32x8xf32>
    %c31_i32_64 = arith.constant 31 : i32
    %193 = tpu.dynamic_rotate %187 by %c31_i32_64 dim 0 : vector<32x8xf32>, i32 -> vector<32x8xf32>
    %cst_65 = arith.constant 0.000000e+00 : f32
    %194 = vector.shape_cast %37 : vector<32x1xi1> to vector<32x1xi1>
    %195 = vector.broadcast %194 : vector<32x1xi1> to vector<32x8xi1>
    %196 = vector.broadcast %cst_65 : f32 to vector<32x8xf32>
    %197 = arith.select %195, %193, %196 : vector<32x8xi1>, vector<32x8xf32>
    %198 = tpu.concatenate %192, %187, %197 in 1 : vector<32x8xf32>, vector<32x8xf32>, vector<32x8xf32> -> vector<32x24xf32>
    %c0_66 = arith.constant 0 : index
    %c0_67 = arith.constant 0 : index
    %199 = vector.load %arg5[%c0_66, %c0_67] : memref<24x8xf32, #tpu.memory_space<vmem>>, vector<24x8xf32>
    %cst_68 = arith.constant dense<0.000000e+00> : vector<32x8xf32>
    %200 = tpu.matmul %198, %199, %cst_68 {dimension_numbers = #tpu.dot_dimension_numbers<[1], [0], [0], [1], [0, 0, 1, 1], [], []>} : vector<32x24xf32>, vector<24x8xf32>, vector<32x8xf32> -> vector<32x8xf32>
    %c0_69 = arith.constant 0 : index
    %c0_70 = arith.constant 0 : index
    %201 = vector.load %arg6[%c0_69, %c0_70] : memref<1x8xf32, #tpu.memory_space<vmem>>, vector<1x8xf32>
    %202 = vector.broadcast %201 : vector<1x8xf32> to vector<32x8xf32>
    %203 = arith.addf %200, %202 : vector<32x8xf32>
    %cst_71 = arith.constant 0.000000e+00 : f32
    %204 = vector.broadcast %cst_71 : f32 to vector<32x8xf32>
    %205 = arith.maximumf %203, %204 : vector<32x8xf32>
    %c2_i32_72 = arith.constant 2 : i32
    %206 = tpu.dynamic_rotate %205 by %c2_i32_72 dim 0 : vector<32x8xf32>, i32 -> vector<32x8xf32>
    %cst_73 = arith.constant 0.000000e+00 : f32
    %207 = vector.shape_cast %105 : vector<32x1xi1> to vector<32x1xi1>
    %208 = vector.broadcast %207 : vector<32x1xi1> to vector<32x8xi1>
    %209 = vector.broadcast %cst_73 : f32 to vector<32x8xf32>
    %210 = arith.select %208, %206, %209 : vector<32x8xi1>, vector<32x8xf32>
    %c1_i32_74 = arith.constant 1 : i32
    %211 = tpu.dynamic_rotate %205 by %c1_i32_74 dim 0 : vector<32x8xf32>, i32 -> vector<32x8xf32>
    %cst_75 = arith.constant 0.000000e+00 : f32
    %212 = vector.shape_cast %25 : vector<32x1xi1> to vector<32x1xi1>
    %213 = vector.broadcast %212 : vector<32x1xi1> to vector<32x8xi1>
    %214 = vector.broadcast %cst_75 : f32 to vector<32x8xf32>
    %215 = arith.select %213, %211, %214 : vector<32x8xi1>, vector<32x8xf32>
    %c31_i32_76 = arith.constant 31 : i32
    %216 = tpu.dynamic_rotate %205 by %c31_i32_76 dim 0 : vector<32x8xf32>, i32 -> vector<32x8xf32>
    %cst_77 = arith.constant 0.000000e+00 : f32
    %217 = vector.shape_cast %37 : vector<32x1xi1> to vector<32x1xi1>
    %218 = vector.broadcast %217 : vector<32x1xi1> to vector<32x8xi1>
    %219 = vector.broadcast %cst_77 : f32 to vector<32x8xf32>
    %220 = arith.select %218, %216, %219 : vector<32x8xi1>, vector<32x8xf32>
    %c30_i32_78 = arith.constant 30 : i32
    %221 = tpu.dynamic_rotate %205 by %c30_i32_78 dim 0 : vector<32x8xf32>, i32 -> vector<32x8xf32>
    %cst_79 = arith.constant 0.000000e+00 : f32
    %222 = vector.shape_cast %127 : vector<32x1xi1> to vector<32x1xi1>
    %223 = vector.broadcast %222 : vector<32x1xi1> to vector<32x8xi1>
    %224 = vector.broadcast %cst_79 : f32 to vector<32x8xf32>
    %225 = arith.select %223, %221, %224 : vector<32x8xi1>, vector<32x8xf32>
    %226 = tpu.concatenate %210, %215, %205, %220, %225 in 1 : vector<32x8xf32>, vector<32x8xf32>, vector<32x8xf32>, vector<32x8xf32>, vector<32x8xf32> -> vector<32x40xf32>
    %c0_80 = arith.constant 0 : index
    %c0_81 = arith.constant 0 : index
    %227 = vector.load %arg7[%c0_80, %c0_81] : memref<40x8xf32, #tpu.memory_space<vmem>>, vector<40x8xf32>
    %cst_82 = arith.constant dense<0.000000e+00> : vector<32x8xf32>
    %228 = tpu.matmul %226, %227, %cst_82 {dimension_numbers = #tpu.dot_dimension_numbers<[1], [0], [0], [1], [0, 0, 1, 1], [], []>} : vector<32x40xf32>, vector<40x8xf32>, vector<32x8xf32> -> vector<32x8xf32>
    %c0_83 = arith.constant 0 : index
    %c0_84 = arith.constant 0 : index
    %229 = vector.load %arg8[%c0_83, %c0_84] : memref<1x8xf32, #tpu.memory_space<vmem>>, vector<1x8xf32>
    %230 = vector.broadcast %229 : vector<1x8xf32> to vector<32x8xf32>
    %231 = arith.addf %228, %230 : vector<32x8xf32>
    %cst_85 = arith.constant 0.000000e+00 : f32
    %232 = vector.broadcast %cst_85 : f32 to vector<32x8xf32>
    %233 = arith.maximumf %231, %232 : vector<32x8xf32>
    %c1_i32_86 = arith.constant 1 : i32
    %234 = tpu.dynamic_rotate %233 by %c1_i32_86 dim 0 : vector<32x8xf32>, i32 -> vector<32x8xf32>
    %cst_87 = arith.constant 0.000000e+00 : f32
    %235 = vector.shape_cast %25 : vector<32x1xi1> to vector<32x1xi1>
    %236 = vector.broadcast %235 : vector<32x1xi1> to vector<32x8xi1>
    %237 = vector.broadcast %cst_87 : f32 to vector<32x8xf32>
    %238 = arith.select %236, %234, %237 : vector<32x8xi1>, vector<32x8xf32>
    %c31_i32_88 = arith.constant 31 : i32
    %239 = tpu.dynamic_rotate %233 by %c31_i32_88 dim 0 : vector<32x8xf32>, i32 -> vector<32x8xf32>
    %cst_89 = arith.constant 0.000000e+00 : f32
    %240 = vector.shape_cast %37 : vector<32x1xi1> to vector<32x1xi1>
    %241 = vector.broadcast %240 : vector<32x1xi1> to vector<32x8xi1>
    %242 = vector.broadcast %cst_89 : f32 to vector<32x8xf32>
    %243 = arith.select %241, %239, %242 : vector<32x8xi1>, vector<32x8xf32>
    %244 = tpu.concatenate %238, %233, %243 in 1 : vector<32x8xf32>, vector<32x8xf32>, vector<32x8xf32> -> vector<32x24xf32>
    %c0_90 = arith.constant 0 : index
    %c0_91 = arith.constant 0 : index
    %245 = vector.load %arg9[%c0_90, %c0_91] : memref<24x1xf32, #tpu.memory_space<vmem>>, vector<24x1xf32>
    %cst_92 = arith.constant dense<0.000000e+00> : vector<32x1xf32>
    %246 = tpu.matmul %244, %245, %cst_92 {dimension_numbers = #tpu.dot_dimension_numbers<[1], [0], [0], [1], [0, 0, 1, 1], [], []>} : vector<32x24xf32>, vector<24x1xf32>, vector<32x1xf32> -> vector<32x1xf32>
    %c0_93 = arith.constant 0 : index
    %c0_94 = arith.constant 0 : index
    %247 = vector.load %arg10[%c0_93, %c0_94] : memref<1x1xf32, #tpu.memory_space<vmem>>, vector<1x1xf32>
    %248 = vector.broadcast %247 : vector<1x1xf32> to vector<32x1xf32>
    %249 = arith.addf %246, %248 : vector<32x1xf32>
    %cst_95 = arith.constant 0.000000e+00 : f32
    %250 = vector.broadcast %cst_95 : f32 to vector<32x1xf32>
    %251 = arith.maximumf %249, %250 : vector<32x1xf32>
    %c0_96 = arith.constant 0 : index
    %c0_97 = arith.constant 0 : index
    %252 = vector.load %arg11[%c0_96, %c0_97] : memref<32x1xf32, #tpu.memory_space<vmem>>, vector<32x1xf32>
    tpu.vector_store %arg11[%c0_96, %c0_97], %251 {strides = array<i32>} : memref<32x1xf32, #tpu.memory_space<vmem>>, vector<32x1xf32>,
    return
  }
}

</mosaic_0001>

<bundles_post_ra>
// kernel: tpu_custom_call.1
= control target key start
LH: loop header
LB: loop body
LE: loop exit
PB: predicated region body
PF: predicated region fallthrough
CT: control target
= control target key end

     0   :  { %v40_v0 = vlaneseq  ;;  %s1938_s23 = smov 35   ;;  %s1939_s18 = smov 70   ;;  %vm247_vm4 = vcmask 1040384   ;;  %vm1940_vm5 = vmmov 1   ;;  %vm203_vm8 = vcmask 285696   ;;  %s2772_s0 = inlined_call_operand.vmem [shape: f32[32,35], index: 0, kind: input, shape index: {}]   ;;  %s2773_s1 = inlined_call_operand.vmem [shape: f32[105,8], index: 1, kind: input, shape index: {}]   ;;  %s2774_s2 = inlined_call_operand.vmem [shape: f32[1,8], index: 2, kind: input, shape index: {}]   ;;  %s2775_s3 = inlined_call_operand.vmem [shape: f32[104,8], index: 3, kind: input, shape index: {}]   ;;  %s2776_s5 = inlined_call_operand.vmem [shape: f32[24,8], index: 5, kind: input, shape index: {}]   ;;  %s2777_s4 = inlined_call_operand.vmem [shape: f32[1,8], index: 4, kind: input, shape index: {}]   ;;  %s2778_s6 = inlined_call_operand.vmem [shape: f32[1,8], index: 6, kind: input, shape index: {}]   ;;  %s2779_s7 = inlined_call_operand.vmem [shape: f32[40,8], index: 7, kind: input, shape index: {}]   ;;  %s2780_s9 = inlined_call_operand.vmem [shape: f32[24,1], index: 9, kind: input, shape index: {}]   ;;  %s2781_s8 = inlined_call_operand.vmem [shape: f32[1,8], index: 8, kind: input, shape index: {}]   ;;  %s2782_s10 = inlined_call_operand.<no memory space> [shape: f32[1,1], index: 10, kind: input, shape index: {}]   ;;  %s2783_s11 = inlined_call_operand.vmem [shape: f32[32,1], index: 11, kind: output, shape index: {}]  }
   0x1   :  { %v93_v1 = vld [vmem:[%s2772_s0] sm:$0xff]  ;;  %v96_v2 = vld [vmem:[%s2772_s0 + $0x18] sm:$0xff]  ;;  %v94_v3 = vld [vmem:[%s2772_s0 + $0x8] sm:$0xff]  ;;  %vm208_vm9 = vcmask 572416   ;;  %vm234_vm10 = vcmask 859136   ;;  %s1942_s16 = smov 32  }
   0x2   :  { %175 = vrot.lane.b32.xlu0 %v93_v1, %s1938_s23  ;;  %v134_v4 = vrot.slane %v93_v1, 1  ;;  %181 = vrot.lane.b32.xlu1 %v96_v2, %s1938_s23  ;;  %v95_v5 = vld [vmem:[%s2772_s0 + $0x10] sm:$0xff]  ;;  %v213_v6 = vld [vmem:[%s2773_s1] sm:$0xff]  ;;  %v97_v7 = vrot.slane %v93_v1, 7  ;;  %v135_v8 = vrot.slane %v94_v3, 1  ;;  %v2030_v9 = vshrl.u32 %v40_v0, 7  ;;  %vm1878_vm6 = vmpackc.low %vm247_vm4, %vm1940_vm5 }
   0x3   :  { %v214_v10 = vld [vmem:[%s2773_s1 + $0x8] sm:$0xff]  ;;  %v215_v11 = vld [vmem:[%s2773_s1 + $0x10] sm:$0xff]  ;;  %v100_v12 = vrot.slane %v96_v2, 7  ;;  %v99_v13 = vrot.slane %v95_v5, 7  ;;  %v136_v14 = vrot.slane %v95_v5, 1  ;;  %v216_v16 = vld [vmem:[%s2773_s1 + $0x18] sm:$0xff] }
   0x4   :  { %v1853_v15 = vpack.c.bf16 %v214_v10, %v213_v6  ;;  %vm138_vm0 = vcmp.lt.s32.totalorder %v2030_v9, 7  ;;  %v42_v17 = vadd.s32 8, %v2030_v9  ;;  %v44_v18 = vadd.s32 24, %v2030_v9  ;;  %v217_v20 = vld [vmem:[%s2773_s1 + $0x20] sm:$0xff]  ;;  %v218_v21 = vld [vmem:[%s2773_s1 + $0x28] sm:$0xff]  ;;  %v219_v34 = vld [vmem:[%s2773_s1 + $0x30] sm:$0xff] }
   0x5   :  { %v1857_v19 = vpack.c.bf16 %v216_v16, %v215_v11  ;;  %v137_v22 = vrot.slane %v96_v2, 1  ;;  %v98_v23 = vrot.slane %v94_v3, 7  ;;  %v141_v24 = vsel %vm138_vm0, %v134_v4, %v135_v8  ;;  %v220_v35 = vld [vmem:[%s2773_s1 + $0x38] sm:$0xff]  ;;  %v221_v42 = vld [vmem:[%s2773_s1 + $0x40] sm:$0xff]  ;;  %v222_v43 = vld [vmem:[%s2773_s1 + $0x48] sm:$0xff]  ;;  %s1943_s17 = smov 8  }
   0x6   :  { %177 = vrot.lane.b32.xlu0 %v94_v3, %s1938_s23  ;;  %191 = vrot.lane.b32.xlu1 %v141_v24, %s1939_s18  ;;  %v2054_v25 = vand.u32 15, %v42_v17  ;;  %v2056_v26 = vand.u32 15, %v44_v18  ;;  %v140_v27 = vsel %vm138_vm0, %v135_v8, %v136_v14  ;;  %v1861_v28 = vpack.c.bf16 %v218_v21, %v217_v20  ;;  %v223_v45 = vld [vmem:[%s2773_s1 + $0x50] sm:$0xff]  ;;  %v224_v46 = vld [vmem:[%s2773_s1 + $0x58] sm:$0xff]  ;;  %s1945_s19 = smov 16   ;;  %s1946_s20 = smov 24  }
   0x7   :  { %1854 = vmatprep.subr.bf16.mxu0 %v1853_v15  ;;  %vm101_vm1 = vcmp.lt.s32.totalorder %v2030_v9, 1  ;;  %v139_v33 = vsel %vm138_vm0, %v136_v14, %v137_v22  ;;  %v142_v37 = vsel %vm138_vm0, %v137_v22, %v134_v4  ;;  %v1865_v40 = vpack.c.bf16 %v220_v35, %v219_v34  ;;  %v225_v48 = vld [vmem:[%s2773_s1 + $0x60] sm:$0xff]  ;;  %v226_v49 = vld [vmem:[%s2773_s1 + $0x68] sm:$0x1]  ;;  %s1947_s21 = smov 56   ;;  %s1948_s22 = smov 64  }
   0x8   :  { %1856 = vmatpush3.bf16.msra.mxu0 %v1853_v15  ;;  %v2062_v29 = vadd.s32 1, %v2054_v25  ;;  %v2065_v30 = vadd.s32 1, %v2056_v26  ;;  %v105_v31 = vsel %vm101_vm1, %v100_v12, %v97_v7  ;;  %v2071_v32 = vsel %vm101_vm1, %v99_v13, %v100_v12  ;;  %v1663_v11 = vld [vmem:[%s2774_s2] ss:$0 sm:$0xff]  ;;  %s1941_s2 = smov 48   ;;  %s1950_s24 = smov 80  }
   0x9   :  { %1858 = vmatprep.subr.bf16.mxu0 %v1857_v19  ;;  %v104_v36 = vsel %vm101_vm1, %v97_v7, %v98_v23  ;;  %v103_v38 = vsel %vm101_vm1, %v98_v23, %v99_v13  ;;  %v1869_v44 = vpack.c.bf16 %v222_v43, %v221_v42  ;;  %v1873_v47 = vpack.c.bf16 %v224_v46, %v223_v45  ;;  %s1951_s25 = smov 88   ;;  %s1952_s26 = smov 96  }
   0xa   :  { %179 = vrot.lane.b32.xlu0 %v95_v5, %s1938_s23  ;;  %vm2793_vm2 = vcmp.lt.s32.totalorder %v2062_v29, 16  ;;  %vm2792_vm3 = vcmp.lt.s32.totalorder %v2065_v30, 16  ;;  %v1877_v50 = vpack.c.bf16 %v226_v49, %v225_v48  ;;  %v2116_v51 = vand.u32 15, %v2030_v9  ;;  %s1949_s23 = smov 72  }
   0xb   :  { %v168_v39 = vsel %vm2793_vm2, %v140_v27, 0.0  ;;  %v170_v41 = vsel %vm2792_vm3, %v142_v37, 0.0  ;;  %v43_v52 = vadd.s32 16, %v2030_v9  ;;  %vm2788_vm12 = vcmp.lt.s32.totalorder %v2030_v9, 2 }
   0xc   :  { %1860 = vmatpush3.bf16.msra.mxu0 %v1857_v19  ;;  %193 = vrot.lane.b32.xlu1 %v168_v39, %s1939_s18  ;;  %v2120_v53 = vadd.s32 4294967295, %v2116_v51  ;;  %vm381_vm13 = vcmp.lt.s32.totalorder %v2030_v9, 5  ;;  %vm418_vm14 = vcmp.lt.s32.totalorder %v2030_v9, 4  ;;  %vm455_vm15 = vcmp.lt.s32.totalorder %v2030_v9, 3 }
   0xd   :  { %1862 = vmatprep.subr.bf16.mxu0 %v1861_v28  ;;  %v2122_v54 = vand.u32 15, %v43_v52  ;;  %v2158_v19 = vadd.s32 4294967291, %v2116_v51  ;;  %vm2789_vm4 = vcmp.lt.s32.totalorder %v2030_v9, 6 }
   0xe   :  { %195 = vrot.lane.b32.xlu0 %v139_v33, %s1939_s18  ;;  %vm2791_vm7 = vcmp.ge.s32.totalorder %v2120_v53, 0 }
   0xf   :  { %v130_v56 = vsel %vm2791_vm7, %v105_v31, 0.0  ;;  %v2128_v58 = vadd.s32 4294967295, %v2122_v54  ;;  %vm390_vm5 = vcmp.ge.s32.totalorder %v2158_v19, 0  ;;  %v460_v19 = vadd.s32 4294967293, %v2116_v51 }
  0x10   :  { %1864 = vmatpush3.bf16.msra.mxu0 %v1861_v28  ;;  %197 = vrot.lane.b32.xlu1 %v170_v41, %s1939_s18  ;;  %s1944_s18 = smov 40  }
  0x11   :  { %1866 = vmatprep.subr.bf16.mxu0 %v1865_v40  ;;  %vm2790_vm11 = vcmp.ge.s32.totalorder %v2128_v58, 0 }
  0x12   :  { %v132_v63 = vsel %vm2790_vm11, %v103_v38, 0.0 }
  0x14   :  { %1868 = vmatpush3.bf16.msra.mxu0 %v1865_v40 }
  0x15   :  { %1870 = vmatprep.subr.bf16.mxu0 %v1869_v44 }
  0x18   :  { %1872 = vmatpush3.bf16.msra.mxu0 %v1869_v44 }
  0x19   :  { %1874 = vmatprep.subr.bf16.mxu0 %v1873_v47 }
  0x1c   :  { %1876 = vmatpush3.bf16.msra.mxu0 %v1873_v47 }
  0x1d   :  { %1879 = vmatprep.subr.msk.bf16.mxu0 %vm1878_vm6, %v1877_v50 }
  0x20   :  { %1882 = vmatpush3.bf16.msk.msra.mxu0 %vm1878_vm6, %v1877_v50 }
  0x74   :  { %v176_v55 = vpop.permute.xlu0 %175  ;;  %v182_v57 = vpop.permute.xlu1 %181 }
  0x75   :  { %v204_v59 = vsel %vm203_vm8, %v130_v56, %v176_v55  ;;  %v207_v7 = vsel %vm203_vm8, %v2071_v32, %v182_v57 }
  0x78   :  { %v178_v60 = vpop.permute.xlu0 %177  ;;  %v192_v61 = vpop.permute.xlu1 %191 }
  0x79   :  { %v209_v62 = vsel %vm208_vm9, %v204_v59, %v192_v61  ;;  %v205_v1 = vsel %vm203_vm8, %v104_v36, %v178_v60 }
  0x7a   :  { %1775 = vmatprep.mubr.msk.f32.mxu0 %vm234_vm10, %v209_v62 }
  0x7c   :  { %v180_v0 = vpop.permute.xlu0 %179 }
  0x7d   :  { %v206_v2 = vsel %vm203_vm8, %v132_v63, %v180_v0  ;;  %v423_v63 = vadd.s32 4294967292, %v2116_v51  ;;  %vm464_vm8 = vcmp.ge.s32.totalorder %v460_v19, 0  ;;  %v953_v19 = vld [vmem:[%s2775_s3 + $0x60] sm:$0xff] }
  0x7e   :  { %v194_v3 = vpop.permute.xlu1 %193 }
  0x7f   :  { %v210_v4 = vsel %vm208_vm9, %v205_v1, %v194_v3  ;;  %vm427_vm6 = vcmp.ge.s32.totalorder %v423_v63, 0  ;;  %v948_v63 = vld [vmem:[%s2775_s3 + $0x38] sm:$0xff] }
  0x80   :  { %v196_v5 = vpop.permute.xlu0 %195  ;;  %1776 = vmatmul.mubr.msk.f32.vlgmr.msra.gmra.mrb[0].mxu0 %vm234_vm10, %v210_v4 }
  0x81   :  { %v211_v6 = vsel %vm208_vm9, %v206_v2, %v196_v5 }
  0x82   :  { %1778 = vmatprep.mubr.msk.f32.mxu0 %vm234_vm10, %v211_v6  ;;  %v198_v8 = vpop.permute.xlu1 %197 }
  0x83   :  { %v212_v10 = vsel %vm208_vm9, %v207_v7, %v198_v8 }
  0x84   :  { %1779 = vmatmul.mubr.msk.f32.gmra.mrb[2].mxu0 %vm234_vm10, %v212_v10 }
 0x153   :  { %v1777_v12 = vpop.f32.mrb[0].mxu0 }
 0x154   :  { %v323_v13 = vadd.f32 %v1777_v12, %v1663_v11  ;;  %v317_v14 = vpop.f32.mrb[1].mxu0 }
 0x155   :  { %v318_v15 = vadd.f32 %v1663_v11, %v317_v14 }
 0x156   :  { %v2149_v16 = vmax.f32 %v323_v13, 0.0 }
 0x157   :  { %v2154_v17 = vmax.f32 %v318_v15, 0.0  ;;  %v1780_v18 = vpop.f32.mrb[2].mxu0 }
 0x158   :  { %v333_v20 = vadd.f32 %v1780_v18, %v1663_v11  ;;  %775 = vrot.lane.b32.xlu0 %v2149_v16, %s1941_s2  ;;  %v327_v21 = vpop.f32.mrb[3].mxu0  ;;  %v489_v22 = vrot.slane %v2149_v16, 6  ;;  %v378_v23 = vrot.slane %v2149_v16, 3  ;;  %v526_v24 = vrot.slane %v2149_v16, 7 }
 0x159   :  { %v328_v27 = vadd.f32 %v1663_v11, %v327_v21  ;;  %773 = vrot.lane.b32.xlu1 %v2154_v17, %s1941_s2  ;;  %v488_v28 = vrot.slane %v2154_v17, 6  ;;  %v377_v31 = vrot.slane %v2154_v17, 3  ;;  %v525_v32 = vrot.slane %v2154_v17, 7 }
 0x15a   :  { %v339_v33 = vmax.f32 %v333_v20, 0.0  ;;  %v414_v34 = vrot.slane %v2154_v17, 4  ;;  %v415_v35 = vrot.slane %v2149_v16, 4  ;;  %v451_v36 = vrot.slane %v2154_v17, 5 }
 0x15b   :  { %v2174_v37 = vmax.f32 %v328_v27, 0.0  ;;  %v2180_v38 = vsel %vm2788_vm12, %v488_v28, %v489_v22  ;;  %v2186_v39 = vsel %vm381_vm13, %v377_v31, %v378_v23  ;;  %v531_v40 = vsel %vm101_vm1, %v525_v32, %v526_v24 }
 0x15c   :  { %743 = vrot.lane.b32.xlu0 %v2180_v38, %s1942_s16  ;;  %v2198_v41 = vsel %vm418_vm14, %v414_v34, %v415_v35  ;;  %v452_v42 = vrot.slane %v2149_v16, 5  ;;  %v380_v43 = vrot.slane %v339_v33, 3  ;;  %v537_v44 = vrot.slane %v2154_v17, 1 }
 0x15d   :  { %695 = vrot.lane.b32.xlu1 %v2186_v39, %s1943_s17  ;;  %v538_v45 = vrot.slane %v2149_v16, 1  ;;  %v417_v46 = vrot.slane %v339_v33, 4  ;;  %v340_v47 = vrot.slane %v2154_v17, 2  ;;  %v341_v48 = vrot.slane %v2149_v16, 2 }
 0x15e   :  { %v2209_v49 = vsel %vm455_vm15, %v451_v36, %v452_v42  ;;  %v2213_v50 = vsel %vm381_vm13, %v380_v43, %v377_v31  ;;  %v454_v52 = vrot.slane %v339_v33, 5  ;;  %v491_v55 = vrot.slane %v339_v33, 6 }
 0x15f   :  { %v543_v56 = vsel %vm138_vm0, %v537_v44, %v538_v45  ;;  %v2219_v57 = vsel %vm418_vm14, %v417_v46, %v414_v34  ;;  %v2223_v59 = vsel %vm2789_vm4, %v340_v47, %v341_v48  ;;  %v379_v62 = vrot.slane %v2174_v37, 3 }
 0x160   :  { %759 = vrot.lane.b32.xlu0 %v531_v40, %s1944_s18  ;;  %v2228_v60 = vsel %vm455_vm15, %v454_v52, %v451_v36  ;;  %v2232_v61 = vsel %vm2788_vm12, %v491_v55, %v488_v28  ;;  %v416_v0 = vrot.slane %v2174_v37, 4  ;;  %v453_v1 = vrot.slane %v2174_v37, 5 }
 0x161   :  { %711 = vrot.lane.b32.xlu1 %v2198_v41, %s1945_s19  ;;  %v2243_v2 = vsel %vm381_vm13, %v379_v62, %v380_v43  ;;  %v490_v3 = vrot.slane %v2174_v37, 6  ;;  %v528_v4 = vrot.slane %v339_v33, 7  ;;  %v527_v5 = vrot.slane %v2174_v37, 7  ;;  %v943_v43 = vld [vmem:[%s2775_s3 + $0x10] sm:$0xff] }
 0x162   :  { %v2249_v6 = vsel %vm418_vm14, %v416_v0, %v417_v46  ;;  %v2253_v7 = vsel %vm455_vm15, %v453_v1, %v454_v52  ;;  %v539_v8 = vrot.slane %v2174_v37, 1  ;;  %v540_v10 = vrot.slane %v339_v33, 1 }
 0x163   :  { %v2259_v11 = vsel %vm2788_vm12, %v490_v3, %v491_v55  ;;  %v532_v12 = vsel %vm101_vm1, %v528_v4, %v525_v32  ;;  %v529_v13 = vsel %vm101_vm1, %v527_v5, %v528_v4  ;;  %v342_v14 = vrot.slane %v2174_v37, 2  ;;  %v950_v4 = vld [vmem:[%s2775_s3 + $0x48] sm:$0xff] }
 0x164   :  { %779 = vrot.lane.b32.xlu0 %v339_v33, %s1941_s2  ;;  %v541_v15 = vsel %vm138_vm0, %v539_v8, %v540_v10  ;;  %v544_v17 = vsel %vm138_vm0, %v540_v10, %v537_v44  ;;  %v343_v18 = vrot.slane %v339_v33, 2  ;;  %v2274_v20 = vsel %vm138_vm0, %v538_v45, %v539_v8  ;;  %v944_v44 = vld [vmem:[%s2775_s3 + $0x18] sm:$0xff]  ;;  %v951_v10 = vld [vmem:[%s2775_s3 + $0x50] sm:$0xff] }
 0x165   :  { %727 = vrot.lane.b32.xlu1 %v2209_v49, %s1946_s20  ;;  %v410_v21 = vsel %vm390_vm5, %v2213_v50, 0.0  ;;  %v2291_v31 = vsel %vm381_vm13, %v378_v23, %v379_v62  ;;  %v2297_v32 = vsel %vm2789_vm4, %v341_v48, %v342_v14  ;;  %v2304_v33 = vsel %vm418_vm14, %v415_v35, %v416_v0  ;;  %v945_v48 = vld [vmem:[%s2775_s3 + $0x20] sm:$0xff]  ;;  %v947_v62 = vld [vmem:[%s2775_s3 + $0x30] sm:$0xff] }
 0x166   :  { %v2281_v27 = vsel %vm2789_vm4, %v342_v14, %v343_v18  ;;  %v2285_v28 = vsel %vm2789_vm4, %v343_v18, %v340_v47  ;;  %v2308_v23 = vsel %vm455_vm15, %v452_v42, %v453_v1  ;;  %v2314_v34 = vsel %vm2788_vm12, %v489_v22, %v490_v3  ;;  %v949_v3 = vld [vmem:[%s2775_s3 + $0x40] sm:$0xff] }
 0x167   :  { %v447_v36 = vsel %vm427_vm6, %v2219_v57, 0.0  ;;  %v2321_v40 = vsel %vm101_vm1, %v526_v24, %v527_v5  ;;  %v2325_v35 = vadd.s32 4294967294, %v2116_v51  ;;  %v484_v22 = vsel %vm464_vm8, %v2228_v60, 0.0 }
 0x168   :  { %693 = vrot.lane.b32.xlu0 %v410_v21, %s1943_s17  ;;  %v533_v24 = vsel %vm2791_vm7, %v532_v12, 0.0  ;;  %v548_v42 = vsel %vm2792_vm3, %v544_v17, 0.0  ;;  %v580_v45 = vadd.s32 3, %v2056_v26  ;;  %v1887_v46 = vpack.c.bf16 %v944_v44, %v943_v43  ;;  %v952_v12 = vld [vmem:[%s2775_s3 + $0x58] sm:$0xff] }
 0x169   :  { %789 = vrot.lane.b32.xlu1 %v543_v56, %s1947_s21  ;;  %vm2785_vm9 = vcmp.ge.s32.totalorder %v2325_v35, 0  ;;  %v608_v52 = vadd.s32 4, %v2056_v26  ;;  %v388_v0 = vadd.s32 4294967291, %v2122_v54  ;;  %v1895_v1 = vpack.c.bf16 %v948_v63, %v947_v62 }
 0x16a   :  { %v521_v16 = vsel %vm2785_vm9, %v2232_v61, 0.0  ;;  %vm588_vm13 = vcmp.lt.s32.totalorder %v580_v45, 16  ;;  %v425_v5 = vadd.s32 4294967292, %v2122_v54  ;;  %v578_v8 = vadd.s32 3, %v2054_v25 }
 0x16b   :  { %v604_v56 = vsel %vm588_vm13, %v2213_v50, 0.0  ;;  %vm616_vm14 = vcmp.lt.s32.totalorder %v608_v52, 16  ;;  %vm392_vm15 = vcmp.ge.s32.totalorder %v388_v0, 0  ;;  %v1903_v14 = vpack.c.bf16 %v952_v12, %v951_v10 }
 0x16c   :  { %709 = vrot.lane.b32.xlu0 %v447_v36, %s1945_s19  ;;  %v632_v50 = vsel %vm616_vm14, %v2219_v57, 0.0  ;;  %v546_v57 = vsel %vm2793_vm2, %v2274_v20, 0.0  ;;  %vm429_vm6 = vcmp.ge.s32.totalorder %v425_v5, 0  ;;  %vm586_vm8 = vcmp.lt.s32.totalorder %v578_v8, 16 }
 0x16d   :  { %805 = vrot.lane.b32.xlu1 %v2223_v59, %s1948_s22  ;;  %v449_v17 = vsel %vm429_vm6, %v2304_v33, 0.0  ;;  %v606_v18 = vadd.s32 4, %v2054_v25  ;;  %v2442_v20 = vadd.s32 4294967294, %v2122_v54  ;;  %v602_v21 = vsel %vm586_vm8, %v2291_v31, 0.0 }
 0x16e   :  { %vm906_vm9 = vcmask 392192   ;;  %v349_v5 = vadd.s32 4294967290, %v2116_v51  ;;  %vm916_vm12 = vcmask 523264   ;;  %vm921_vm4 = vcmask 588800  }
 0x16f   :  { %vm614_vm14 = vcmp.lt.s32.totalorder %v606_v18, 16  ;;  %vm936_vm7 = vcmask 785408   ;;  %vm961_vm3 = vcmask 850944  }
 0x170   :  { %725 = vrot.lane.b32.xlu0 %v484_v22, %s1946_s20  ;;  %v634_v22 = vadd.s32 5, %v2054_v25 }
 0x171   :  { %821 = vrot.lane.b32.xlu1 %v2186_v39, %s1949_s23  ;;  %v2359_v39 = vadd.s32 2, %v2056_v26 }
 0x172   :  { %vm642_vm6 = vcmp.lt.s32.totalorder %v634_v22, 16 }
 0x173   :  { %vm2786_vm10 = vcmp.lt.s32.totalorder %v2359_v39, 16 }
 0x174   :  { %741 = vrot.lane.b32.xlu0 %v521_v16, %s1942_s16  ;;  %v576_v47 = vsel %vm2786_vm10, %v2285_v28, 0.0  ;;  %v630_v16 = vsel %vm614_vm14, %v2304_v33, 0.0  ;;  %v535_v33 = vsel %vm2790_vm11, %v2321_v40, 0.0  ;;  %vm353_vm10 = vcmp.ge.s32.totalorder %v349_v5, 0 }
 0x175   :  { %837 = vrot.lane.b32.xlu1 %v2198_v41, %s1950_s24  ;;  %v373_v8 = vsel %vm353_vm10, %v2285_v28, 0.0  ;;  %vm926_vm10 = vcmask 654336   ;;  %vm931_vm11 = vcmask 719872  }
 0x178   :  { %699 = vrot.lane.b32.xlu0 %v2243_v2, %s1943_s17 }
 0x179   :  { %853 = vrot.lane.b32.xlu1 %v2209_v49, %s1951_s25  ;;  %v946_v49 = vld [vmem:[%s2775_s3 + $0x28] sm:$0xff] }
 0x17a   :  { %v1891_v55 = vpack.c.bf16 %v946_v49, %v945_v48 }
 0x17c   :  { %715 = vrot.lane.b32.xlu0 %v2249_v6, %s1945_s19 }
 0x17d   :  { %869 = vrot.lane.b32.xlu1 %v2180_v38, %s1952_s26  ;;  %v941_v38 = vld [vmem:[%s2775_s3] sm:$0xff] }
 0x180   :  { %731 = vrot.lane.b32.xlu0 %v2253_v7, %s1946_s20 }
 0x181   :  { %777 = vrot.lane.b32.xlu1 %v2174_v37, %s1941_s2  ;;  %v942_v37 = vld [vmem:[%s2775_s3 + $0x8] sm:$0xff] }
 0x182   :  { %v1883_v41 = vpack.c.bf16 %v942_v37, %v941_v38  ;;  %v636_v38 = vadd.s32 5, %v2056_v26  ;;  %v658_v37 = vsel %vm642_vm6, %v2308_v23, 0.0  ;;  %vm881_vm6 = vcmask 64512  }
 0x184   :  { %747 = vrot.lane.b32.xlu0 %v2259_v11, %s1942_s16  ;;  %1884 = vmatprep.subr.bf16.mxu1 %v1883_v41 }
 0x185   :  { %757 = vrot.lane.b32.xlu1 %v533_v24, %s1944_s18  ;;  %1886 = vmatpush3.bf16.msra.mxu1 %v1883_v41  ;;  %v662_v24 = vadd.s32 6, %v2054_v25  ;;  %v664_v41 = vadd.s32 6, %v2056_v26 }
 0x186   :  { %1888 = vmatprep.subr.bf16.mxu1 %v1887_v46 }
 0x187   :  { %vm670_vm8 = vcmp.lt.s32.totalorder %v662_v24, 16  ;;  %vm672_vm14 = vcmp.lt.s32.totalorder %v664_v41, 16 }
 0x188   :  { %763 = vrot.lane.b32.xlu0 %v529_v13, %s1944_s18  ;;  %v462_v13 = vadd.s32 4294967293, %v2122_v54 }
 0x189   :  { %793 = vrot.lane.b32.xlu1 %v541_v15, %s1947_s21  ;;  %1890 = vmatpush3.bf16.msra.mxu1 %v1887_v46 }
 0x18a   :  { %1892 = vmatprep.subr.bf16.mxu1 %v1891_v55  ;;  %vm466_vm13 = vcmp.ge.s32.totalorder %v462_v13, 0 }
 0x18b   :  { %v486_v36 = vsel %vm466_vm13, %v2308_v23, 0.0  ;;  %vm644_vm13 = vcmp.lt.s32.totalorder %v636_v38, 16  ;;  %v688_v23 = vsel %vm672_vm14, %v2232_v61, 0.0  ;;  %vm901_vm14 = vcmask 326656  }
 0x18c   :  { %795 = vrot.lane.b32.xlu0 %v548_v42, %s1947_s21  ;;  %v660_v42 = vsel %vm644_vm13, %v2228_v60, 0.0  ;;  %vm891_vm13 = vcmask 195584  }
 0x18d   :  { %809 = vrot.lane.b32.xlu1 %v2281_v27, %s1948_s22  ;;  %1894 = vmatpush3.bf16.msra.mxu1 %v1891_v55 }
 0x18e   :  { %1896 = vmatprep.subr.bf16.mxu1 %v1895_v1 }
 0x190   :  { %811 = vrot.lane.b32.xlu0 %v576_v47, %s1948_s22 }
 0x191   :  { %825 = vrot.lane.b32.xlu1 %v2243_v2, %s1949_s23  ;;  %v2409_v2 = vadd.s32 2, %v2054_v25  ;;  %1898 = vmatpush3.bf16.msra.mxu1 %v1895_v1  ;;  %v686_v25 = vsel %vm670_vm8, %v2314_v34, 0.0  ;;  %vm886_vm8 = vcmask 130048  }
 0x193   :  { %vm2787_vm5 = vcmp.lt.s32.totalorder %v2409_v2, 16 }
 0x194   :  { %841 = vrot.lane.b32.xlu0 %v2249_v6, %s1950_s24  ;;  %v1899_v6 = vpack.c.bf16 %v950_v4, %v949_v3  ;;  %v574_v15 = vsel %vm2787_vm5, %v2297_v32, 0.0  ;;  %vm911_vm5 = vcmask 457728  }
 0x195   :  { %827 = vrot.lane.b32.xlu1 %v604_v56, %s1949_s23 }
 0x196   :  { %1900 = vmatprep.subr.bf16.mxu1 %v1899_v6 }
 0x197   :  { %1902 = vmatpush3.bf16.msra.mxu1 %v1899_v6 }
 0x198   :  { %857 = vrot.lane.b32.xlu0 %v2253_v7, %s1951_s25  ;;  %v412_v7 = vsel %vm392_vm15, %v2291_v31, 0.0  ;;  %1904 = vmatprep.subr.bf16.mxu1 %v1903_v14  ;;  %vm2784_vm15 = vcmp.ge.s32.totalorder %v2442_v20, 0 }
 0x199   :  { %843 = vrot.lane.b32.xlu1 %v632_v50, %s1950_s24  ;;  %v523_v31 = vsel %vm2784_vm15, %v2314_v34, 0.0  ;;  %vm896_vm15 = vcmask 261120  }
 0x19b   :  { %1906 = vmatpush3.bf16.msra.mxu1 %v1903_v14 }
 0x19c   :  { %791 = vrot.lane.b32.xlu0 %v546_v57, %s1947_s21  ;;  %1805 = vmatprep.subr.mxu1 %v953_v19 }
 0x19d   :  { %697 = vrot.lane.b32.xlu1 %v412_v7, %s1943_s17 }
 0x19f   :  { %1806 = vmatpush3.msra.mxu1 %v953_v19 }
 0x1a0   :  { %807 = vrot.lane.b32.xlu0 %v574_v15, %s1948_s22 }
 0x1a1   :  { %713 = vrot.lane.b32.xlu1 %v449_v17, %s1945_s19 }
 0x1a4   :  { %823 = vrot.lane.b32.xlu0 %v602_v21, %s1949_s23 }
 0x1a5   :  { %729 = vrot.lane.b32.xlu1 %v486_v36, %s1946_s20 }
 0x1a8   :  { %839 = vrot.lane.b32.xlu0 %v630_v16, %s1950_s24 }
 0x1a9   :  { %745 = vrot.lane.b32.xlu1 %v523_v31, %s1942_s16 }
 0x1ac   :  { %855 = vrot.lane.b32.xlu0 %v658_v37, %s1951_s25 }
 0x1ad   :  { %761 = vrot.lane.b32.xlu1 %v535_v33, %s1944_s18 }
 0x1b0   :  { %871 = vrot.lane.b32.xlu0 %v686_v25, %s1952_s26 }
 0x1b1   :  { %859 = vrot.lane.b32.xlu1 %v660_v42, %s1951_s25 }
 0x1b4   :  { %873 = vrot.lane.b32.xlu0 %v2259_v11, %s1952_s26 }
 0x1b5   :  { %875 = vrot.lane.b32.xlu1 %v688_v23, %s1952_s26 }
 0x1ca   :  { %v776_v40 = vpop.permute.xlu0 %775 }
 0x1cb   :  { %v774_v43 = vpop.permute.xlu1 %773 }
 0x1ce   :  { %v744_v44 = vpop.permute.xlu0 %743 }
 0x1cf   :  { %v696_v26 = vpop.permute.xlu1 %695 }
 0x1d0   :  { %v883_v60 = vsel %vm881_vm6, %v2223_v59, %v696_v26 }
 0x1d2   :  { %v760_v34 = vpop.permute.xlu0 %759 }
 0x1d3   :  { %v712_v45 = vpop.permute.xlu1 %711 }
 0x1d4   :  { %v888_v46 = vsel %vm886_vm8, %v883_v60, %v712_v45  ;;  %v351_v45 = vadd.s32 4294967290, %v2122_v54 }
 0x1d6   :  { %v2479_v47 = vpop.permute.xlu0 %779  ;;  %vm355_vm2 = vcmp.ge.s32.totalorder %v351_v45, 0 }
 0x1d7   :  { %v728_v61 = vpop.permute.xlu1 %727 }
 0x1d8   :  { %v893_v11 = vsel %vm891_vm13, %v888_v46, %v728_v61 }
 0x1d9   :  { %v898_v48 = vsel %vm896_vm15, %v893_v11, %v744_v44 }
 0x1da   :  { %v694_v49 = vpop.permute.xlu0 %693  ;;  %v903_v52 = vsel %vm901_vm14, %v898_v48, %v760_v34  ;;  %v375_v48 = vsel %vm355_vm2, %v2297_v32, 0.0  ;;  %vm2794_vm2 = vcmp.lt.s32.totalorder %v2062_v29, 16 }
 0x1db   :  { %v790_v55 = vpop.permute.xlu1 %789  ;;  %v2485_v59 = vsel %vm906_vm9, %v903_v52, %v776_v40  ;;  %v882_v12 = vsel %vm881_vm6, %v373_v8, %v694_v49 }
 0x1de   :  { %v710_v56 = vpop.permute.xlu0 %709 }
 0x1df   :  { %v806_v62 = vpop.permute.xlu1 %805  ;;  %v887_v13 = vsel %vm886_vm8, %v882_v12, %v710_v56 }
 0x1e2   :  { %v726_v63 = vpop.permute.xlu0 %725 }
 0x1e3   :  { %v822_v0 = vpop.permute.xlu1 %821  ;;  %v892_v14 = vsel %vm891_vm13, %v887_v13, %v726_v63 }
 0x1e6   :  { %v742_v1 = vpop.permute.xlu0 %741 }
 0x1e7   :  { %v838_v50 = vpop.permute.xlu1 %837  ;;  %v897_v17 = vsel %vm896_vm15, %v892_v14, %v742_v1 }
 0x1ea   :  { %v700_v3 = vpop.permute.xlu0 %699 }
 0x1eb   :  { %v854_v4 = vpop.permute.xlu1 %853  ;;  %v885_v49 = vsel %vm881_vm6, %v2281_v27, %v700_v3 }
 0x1ee   :  { %v716_v6 = vpop.permute.xlu0 %715 }
 0x1ef   :  { %v870_v57 = vpop.permute.xlu1 %869 }
 0x1f2   :  { %v732_v7 = vpop.permute.xlu0 %731 }
 0x1f3   :  { %v778_v10 = vpop.permute.xlu1 %777 }
 0x1f6   :  { %v748_v15 = vpop.permute.xlu0 %747 }
 0x1f7   :  { %v758_v18 = vpop.permute.xlu1 %757 }
 0x1f8   :  { %v902_v51 = vsel %vm901_vm14, %v897_v17, %v758_v18 }
 0x1f9   :  { %v907_v21 = vsel %vm906_vm9, %v902_v51, %v774_v43 }
 0x1fa   :  { %v764_v19 = vpop.permute.xlu0 %763  ;;  %v912_v28 = vsel %vm911_vm5, %v907_v21, %v790_v55  ;;  %v890_v55 = vsel %vm886_vm8, %v885_v49, %v716_v6 }
 0x1fb   :  { %v794_v36 = vpop.permute.xlu1 %793  ;;  %v917_v22 = vsel %vm916_vm12, %v912_v28, %v806_v62  ;;  %v895_v62 = vsel %vm891_vm13, %v890_v55, %v732_v7 }
 0x1fc   :  { %v922_v16 = vsel %vm921_vm4, %v917_v22, %v822_v0  ;;  %v900_v54 = vsel %vm896_vm15, %v895_v62, %v748_v15 }
 0x1fd   :  { %v927_v31 = vsel %vm926_vm10, %v922_v16, %v838_v50  ;;  %v905_v50 = vsel %vm901_vm14, %v900_v54, %v764_v19 }
 0x1fe   :  { %v796_v24 = vpop.permute.xlu0 %795  ;;  %v932_v38 = vsel %vm931_vm11, %v927_v31, %v854_v4 }
 0x1ff   :  { %v810_v37 = vpop.permute.xlu1 %809  ;;  %v937_v33 = vsel %vm936_vm7, %v932_v38, %v870_v57  ;;  %v1127_v38 = vld [vmem:[%s2776_s5] sm:$0xff] }
 0x200   :  { %1807 = vmatprep.mubr.msk.f32.mxu1 %vm961_vm3, %v937_v33 }
 0x202   :  { %v812_v41 = vpop.permute.xlu0 %811 }
 0x203   :  { %v826_v25 = vpop.permute.xlu1 %825 }
 0x206   :  { %v842_v42 = vpop.permute.xlu0 %841 }
 0x207   :  { %v828_v23 = vpop.permute.xlu1 %827 }
 0x20a   :  { %v858_v40 = vpop.permute.xlu0 %857 }
 0x20b   :  { %v844_v43 = vpop.permute.xlu1 %843 }
 0x20e   :  { %v792_v44 = vpop.permute.xlu0 %791 }
 0x20f   :  { %v698_v26 = vpop.permute.xlu1 %697  ;;  %v913_v0 = vsel %vm911_vm5, %v2485_v59, %v792_v44  ;;  %v910_v59 = vsel %vm906_vm9, %v905_v50, %v2479_v47 }
 0x210   :  { %v884_v56 = vsel %vm881_vm6, %v375_v48, %v698_v26  ;;  %v915_v14 = vsel %vm911_vm5, %v910_v59, %v796_v24 }
 0x211   :  { %v920_v51 = vsel %vm916_vm12, %v915_v14, %v812_v41  ;;  %v1129_v41 = vld [vmem:[%s2776_s5 + $0x10] sm:$0xff] }
 0x212   :  { %v808_v34 = vpop.permute.xlu0 %807  ;;  %v925_v47 = vsel %vm921_vm4, %v920_v51, %v828_v23 }
 0x213   :  { %v714_v60 = vpop.permute.xlu1 %713  ;;  %v918_v27 = vsel %vm916_vm12, %v913_v0, %v808_v34  ;;  %v930_v19 = vsel %vm926_vm10, %v925_v47, %v844_v43 }
 0x214   :  { %v889_v63 = vsel %vm886_vm8, %v884_v56, %v714_v60 }
 0x216   :  { %v824_v46 = vpop.permute.xlu0 %823 }
 0x217   :  { %v730_v61 = vpop.permute.xlu1 %729  ;;  %v923_v5 = vsel %vm921_vm4, %v918_v27, %v824_v46 }
 0x218   :  { %v894_v1 = vsel %vm891_vm13, %v889_v63, %v730_v61 }
 0x21a   :  { %v840_v11 = vpop.permute.xlu0 %839 }
 0x21b   :  { %v746_v52 = vpop.permute.xlu1 %745  ;;  %v928_v57 = vsel %vm926_vm10, %v923_v5, %v840_v11 }
 0x21c   :  { %v899_v3 = vsel %vm896_vm15, %v894_v1, %v746_v52 }
 0x21e   :  { %v856_v32 = vpop.permute.xlu0 %855 }
 0x21f   :  { %v762_v4 = vpop.permute.xlu1 %761  ;;  %v933_v8 = vsel %vm931_vm11, %v928_v57, %v856_v32 }
 0x220   :  { %v904_v6 = vsel %vm901_vm14, %v899_v3, %v762_v4 }
 0x221   :  { %v909_v7 = vsel %vm906_vm9, %v904_v6, %v778_v10 }
 0x222   :  { %v914_v12 = vsel %vm911_vm5, %v909_v7, %v794_v36  ;;  %v872_v13 = vpop.permute.xlu0 %871 }
 0x223   :  { %v919_v15 = vsel %vm916_vm12, %v914_v12, %v810_v37  ;;  %v938_v17 = vsel %vm936_vm7, %v933_v8, %v872_v13  ;;  %v860_v18 = vpop.permute.xlu1 %859  ;;  %v1128_v37 = vld [vmem:[%s2776_s5 + $0x8] sm:$0xff]  ;;  %vm2798_vm12 = vcmp.lt.s32.totalorder %v2030_v9, 6 }
 0x224   :  { %1808 = vmatmul.mubr.msk.f32.vlgmr.msra.gmra.mrb[0].mxu1 %vm961_vm3, %v938_v17  ;;  %v924_v10 = vsel %vm921_vm4, %v919_v15, %v826_v25  ;;  %v935_v22 = vsel %vm931_vm11, %v930_v19, %v860_v18  ;;  %v1907_v33 = vpack.c.bf16 %v1128_v37, %v1127_v38  ;;  %v1669_v25 = vld [vmem:[%s2777_s4] ss:$0 sm:$0xff]  ;;  %vm2799_vm4 = vcmp.lt.s32.totalorder %v2030_v9, 2  ;;  %vm2800_vm9 = vmmov %vm2798_vm12 }
 0x225   :  { %v929_v21 = vsel %vm926_vm10, %v924_v10, %v842_v42  ;;  %vm2801_vm5 = vmmov %vm2800_vm9 }
 0x226   :  { %v874_v28 = vpop.permute.xlu0 %873  ;;  %v934_v36 = vsel %vm931_vm11, %v929_v21, %v858_v40  ;;  %1908 = vmatprep.subr.bf16.mxu1 %v1907_v33  ;;  %vm2797_vm11 = vcmp.ge.s32.totalorder %v2128_v58, 0  ;;  %vm2802_vm10 = vmmov %vm2801_vm5 }
 0x227   :  { %v939_v16 = vsel %vm936_vm7, %v934_v36, %v874_v28  ;;  %v876_v31 = vpop.permute.xlu1 %875  ;;  %1910 = vmatpush3.bf16.msra.mxu1 %v1907_v33 }
 0x228   :  { %v940_v24 = vsel %vm936_vm7, %v935_v22, %v876_v31  ;;  %1810 = vmatprep.mubr.msk.f32.mxu1 %vm961_vm3, %v939_v16  ;;  %1817 = vmatprep.subr.mxu1 %v1129_v41  ;;  %vm2796_vm7 = vcmp.ge.s32.totalorder %v2120_v53, 0  ;;  %v1674_v31 = vld [vmem:[%s2778_s6] ss:$0 sm:$0xff] }
 0x229   :  { %1811 = vmatmul.mubr.msk.f32.gmra.mrb[2].mxu1 %vm961_vm3, %v940_v24  ;;  %vm2795_vm3 = vcmp.lt.s32.totalorder %v2065_v30, 16 }
 0x22b   :  { %1818 = vmatpush3.msra.mxu1 %v1129_v41 }
 0x2f7   :  { %v1809_v42 = vpop.f32.mrb[0].mxu1 }
 0x2f8   :  { %v1046_v23 = vadd.f32 %v1809_v42, %v1669_v25  ;;  %v1040_v40 = vpop.f32.mrb[1].mxu1 }
 0x2f9   :  { %v1041_v43 = vadd.f32 %v1669_v25, %v1040_v40 }
 0x2fa   :  { %v1060_v44 = vmax.f32 %v1046_v23, 0.0 }
 0x2fb   :  { %v1059_v26 = vmax.f32 %v1041_v43, 0.0 }
 0x2fc   :  { %v1064_v34 = vrot.slane %v1060_v44, 7  ;;  %v1076_v60 = vrot.slane %v1060_v44, 1  ;;  %1093 = vrot.lane.b32.xlu1 %v1060_v44, %s1943_s17  ;;  %v1812_v45 = vpop.f32.mrb[2].mxu1 }
 0x2fd   :  { %v1063_v46 = vrot.slane %v1059_v26, 7  ;;  %v1075_v61 = vrot.slane %v1059_v26, 1  ;;  %v1056_v11 = vadd.f32 %v1812_v45, %v1669_v25  ;;  %v1050_v48 = vpop.f32.mrb[3].mxu1  ;;  %1091 = vrot.lane.b32.xlu0 %v1059_v26, %s1943_s17 }
 0x2fe   :  { %v1051_v49 = vadd.f32 %v1669_v25, %v1050_v48 }
 0x2ff   :  { %v1062_v52 = vmax.f32 %v1056_v11, 0.0  ;;  %v1081_v55 = vsel %vm138_vm0, %v1075_v61, %v1076_v60  ;;  %v1069_v56 = vsel %vm101_vm1, %v1063_v46, %v1064_v34 }
 0x300   :  { %v1061_v62 = vmax.f32 %v1051_v49, 0.0 }
 0x301   :  { %v1066_v63 = vrot.slane %v1062_v52, 7  ;;  %v1078_v54 = vrot.slane %v1062_v52, 1  ;;  %1097 = vrot.lane.b32.xlu1 %v1062_v52, %s1943_s17  ;;  %1107 = vrot.lane.b32.xlu0 %v1081_v55, %s1945_s19 }
 0x302   :  { %v1065_v0 = vrot.slane %v1061_v62, 7  ;;  %v1077_v1 = vrot.slane %v1061_v62, 1 }
 0x303   :  { %v1082_v32 = vsel %vm138_vm0, %v1078_v54, %v1075_v61  ;;  %v1070_v50 = vsel %vm101_vm1, %v1066_v63, %v1063_v46 }
 0x304   :  { %v1080_v27 = vsel %vm138_vm0, %v1076_v60, %v1077_v1  ;;  %v1079_v3 = vsel %vm138_vm0, %v1077_v1, %v1078_v54  ;;  %v1067_v5 = vsel %vm101_vm1, %v1065_v0, %v1066_v63  ;;  %v1068_v6 = vsel %vm101_vm1, %v1064_v34, %v1065_v0  ;;  %v1366_v34 = vld [vmem:[%s2779_s7] sm:$0xff]  ;;  %v1367_v60 = vld [vmem:[%s2779_s7 + $0x8] sm:$0xff] }
 0x305   :  { %1095 = vrot.lane.b32.xlu0 %v1061_v62, %s1943_s17  ;;  %v1084_v4 = vsel %vm2794_vm2, %v1080_v27, 0.0  ;;  %v1086_v57 = vsel %vm2795_vm3, %v1082_v32, 0.0  ;;  %v1071_v8 = vsel %vm2796_vm7, %v1070_v50, 0.0  ;;  %v1073_v47 = vsel %vm2797_vm11, %v1068_v6, 0.0  ;;  %vm2803_vm2 = vmmov %vm2799_vm4 }
 0x306   :  { %1109 = vrot.lane.b32.xlu1 %v1084_v4, %s1945_s19  ;;  %v1911_v55 = vpack.c.bf16 %v1367_v60, %v1366_v34  ;;  %vm2804_vm3 = vmmov %vm2803_vm2  ;;  %vm2806_vm11 = vcmp.lt.s32.totalorder %v2065_v30, 16 }
 0x307   :  { %vm2805_vm7 = vmmov %vm2803_vm2 }
 0x308   :  { %1912 = vmatprep.subr.bf16.mxu0 %v1911_v55 }
 0x309   :  { %1111 = vrot.lane.b32.xlu0 %v1079_v3, %s1945_s19  ;;  %1914 = vmatpush3.bf16.msra.mxu0 %v1911_v55 }
 0x30a   :  { %1113 = vrot.lane.b32.xlu1 %v1086_v57, %s1945_s19 }
 0x36e   :  { %v1094_v7 = vpop.permute.xlu1 %1093 }
 0x36f   :  { %v1092_v59 = vpop.permute.xlu0 %1091  ;;  %v1120_v18 = vsel %vm881_vm6, %v1069_v56, %v1094_v7 }
 0x370   :  { %v1119_v12 = vsel %vm881_vm6, %v1071_v8, %v1092_v59 }
 0x373   :  { %v1098_v13 = vpop.permute.xlu1 %1097  ;;  %v1108_v14 = vpop.permute.xlu0 %1107 }
 0x374   :  { %v1123_v15 = vsel %vm886_vm8, %v1119_v12, %v1108_v14  ;;  %v1122_v28 = vsel %vm881_vm6, %v1067_v5, %v1098_v13  ;;  %v1368_v13 = vld [vmem:[%s2779_s7 + $0x10] sm:$0xff]  ;;  %v1369_v14 = vld [vmem:[%s2779_s7 + $0x18] sm:$0xff] }
 0x375   :  { %1819 = vmatprep.mubr.msk.f32.mxu1 %vm891_vm13, %v1123_v15 }
 0x377   :  { %v1096_v17 = vpop.permute.xlu0 %1095 }
 0x378   :  { %v1110_v51 = vpop.permute.xlu1 %1109  ;;  %v1121_v21 = vsel %vm881_vm6, %v1073_v47, %v1096_v17 }
 0x379   :  { %v1124_v10 = vsel %vm886_vm8, %v1120_v18, %v1110_v51 }
 0x37a   :  { %1820 = vmatmul.mubr.msk.f32.vlgmr.msra.gmra.mrb[4].mxu1 %vm891_vm13, %v1124_v10 }
 0x37b   :  { %v1112_v19 = vpop.permute.xlu0 %1111 }
 0x37c   :  { %v1125_v36 = vsel %vm886_vm8, %v1121_v21, %v1112_v19  ;;  %v1114_v22 = vpop.permute.xlu1 %1113  ;;  %v1915_v21 = vpack.c.bf16 %v1369_v14, %v1368_v13 }
 0x37d   :  { %v1126_v16 = vsel %vm886_vm8, %v1122_v28, %v1114_v22  ;;  %1822 = vmatprep.mubr.msk.f32.mxu1 %vm891_vm13, %v1125_v36  ;;  %v1370_v28 = vld [vmem:[%s2779_s7 + $0x20] sm:$0xff] }
 0x37e   :  { %1823 = vmatmul.mubr.msk.f32.gmra.mrb[6].mxu1 %vm891_vm13, %v1126_v16  ;;  %1916 = vmatprep.subr.bf16.mxu0 %v1915_v21 }
 0x37f   :  { %1918 = vmatpush3.bf16.msra.mxu0 %v1915_v21 }
 0x380   :  { %1833 = vmatprep.subr.mxu0 %v1370_v28 }
 0x383   :  { %1834 = vmatpush3.msra.mxu0 %v1370_v28 }
 0x44d   :  { %v1821_v24 = vpop.f32.mrb[4].mxu1 }
 0x44e   :  { %v1221_v38 = vadd.f32 %v1821_v24, %v1674_v31  ;;  %v1215_v37 = vpop.f32.mrb[5].mxu1 }
 0x44f   :  { %v1216_v33 = vadd.f32 %v1674_v31, %v1215_v37 }
 0x450   :  { %v1235_v41 = vmax.f32 %v1221_v38, 0.0 }
 0x451   :  { %v1234_v25 = vmax.f32 %v1216_v33, 0.0  ;;  %v1824_v42 = vpop.f32.mrb[6].mxu1 }
 0x452   :  { %v1231_v23 = vadd.f32 %v1824_v42, %v1674_v31  ;;  %1308 = vrot.lane.b32.xlu1 %v1235_v41, %s1945_s19  ;;  %v1225_v40 = vpop.f32.mrb[7].mxu1  ;;  %v1251_v43 = vrot.slane %v1235_v41, 7  ;;  %v1263_v44 = vrot.slane %v1235_v41, 1  ;;  %v1275_v26 = vrot.slane %v1235_v41, 2 }
 0x453   :  { %v1226_v45 = vadd.f32 %v1674_v31, %v1225_v40  ;;  %1306 = vrot.lane.b32.xlu0 %v1234_v25, %s1945_s19  ;;  %v1250_v46 = vrot.slane %v1234_v25, 7  ;;  %v1262_v61 = vrot.slane %v1234_v25, 1  ;;  %v1274_v11 = vrot.slane %v1234_v25, 2 }
 0x454   :  { %v1237_v48 = vmax.f32 %v1231_v23, 0.0  ;;  %v1239_v49 = vrot.slane %v1235_v41, 6  ;;  %v1238_v52 = vrot.slane %v1234_v25, 6 }
 0x455   :  { %v1236_v56 = vmax.f32 %v1226_v45, 0.0  ;;  %v1256_v62 = vsel %vm101_vm1, %v1250_v46, %v1251_v43  ;;  %v1268_v63 = vsel %vm138_vm0, %v1262_v61, %v1263_v44  ;;  %v1280_v54 = vsel %vm2798_vm12, %v1274_v11, %v1275_v26 }
 0x456   :  { %1292 = vrot.lane.b32.xlu1 %v1256_v62, %s1943_s17  ;;  %v1253_v0 = vrot.slane %v1237_v48, 7  ;;  %v1265_v1 = vrot.slane %v1237_v48, 1  ;;  %v1277_v32 = vrot.slane %v1237_v48, 2  ;;  %v2616_v50 = vsel %vm2799_vm4, %v1238_v52, %v1239_v49 }
 0x457   :  { %1322 = vrot.lane.b32.xlu0 %v1268_v63, %s1946_s20  ;;  %v1252_v27 = vrot.slane %v1236_v56, 7  ;;  %v1264_v3 = vrot.slane %v1236_v56, 1  ;;  %v1276_v4 = vrot.slane %v1236_v56, 2  ;;  %v1240_v5 = vrot.slane %v1236_v56, 6 }
 0x458   :  { %v1269_v6 = vsel %vm138_vm0, %v1265_v1, %v1262_v61  ;;  %v1257_v57 = vsel %vm101_vm1, %v1253_v0, %v1250_v46  ;;  %v1281_v7 = vsel %vm2800_vm9, %v1277_v32, %v1274_v11  ;;  %v1241_v59 = vrot.slane %v1237_v48, 6 }
 0x459   :  { %v1254_v8 = vsel %vm101_vm1, %v1252_v27, %v1253_v0  ;;  %v1267_v12 = vsel %vm138_vm0, %v1263_v44, %v1264_v3  ;;  %v1266_v15 = vsel %vm138_vm0, %v1264_v3, %v1265_v1  ;;  %v1255_v17 = vsel %vm101_vm1, %v1251_v43, %v1252_v27 }
 0x45a   :  { %1312 = vrot.lane.b32.xlu1 %v1237_v48, %s1945_s19  ;;  %v1279_v18 = vsel %vm2801_vm5, %v1275_v26, %v1276_v4  ;;  %v1278_v51 = vsel %vm2802_vm10, %v1276_v4, %v1277_v32  ;;  %v1242_v10 = vsel %vm2803_vm2, %v1240_v5, %v1241_v59  ;;  %v1245_v47 = vsel %vm2804_vm3, %v1241_v59, %v1238_v52  ;;  %v1543_v4 = vld [vmem:[%s2780_s9] sm:$0xff] }
 0x45b   :  { %1338 = vrot.lane.b32.xlu0 %v1280_v54, %s1942_s16  ;;  %v1243_v19 = vsel %vm2805_vm7, %v1239_v49, %v1240_v5  ;;  %v1273_v36 = vsel %vm2806_vm11, %v1269_v6, 0.0  ;;  %vm2807_vm12 = vcmp.ge.s32.totalorder %v2120_v53, 0  ;;  %vm2808_vm4 = vcmp.lt.s32.totalorder %v2062_v29, 16  ;;  %v1544_v5 = vld [vmem:[%s2780_s9 + $0x8] sm:$0xff] }
 0x45c   :  { %v1258_v22 = vsel %vm2807_vm12, %v1257_v57, 0.0  ;;  %v1271_v16 = vsel %vm2808_vm4, %v1267_v12, 0.0  ;;  %vm2809_vm9 = vcmp.ge.s32.totalorder %v2128_v58, 0  ;;  %vm2810_vm5 = vcmp.lt.s32.totalorder %v2409_v2, 16  ;;  %v1545_v57 = vld [vmem:[%s2780_s9 + $0x10] sm:$0xff] }
 0x45d   :  { %v1260_v31 = vsel %vm2809_vm9, %v1255_v17, 0.0  ;;  %v1283_v24 = vsel %vm2810_vm5, %v1279_v18, 0.0  ;;  %vm2811_vm10 = vcmp.lt.s32.totalorder %v2359_v39, 16  ;;  %vm2812_vm2 = vcmp.ge.s32.totalorder %v2325_v35, 0 }
 0x45e   :  { %1296 = vrot.lane.b32.xlu1 %v1254_v8, %s1943_s17  ;;  %v1285_v38 = vsel %vm2811_vm10, %v1281_v7, 0.0  ;;  %v1246_v26 = vsel %vm2812_vm2, %v1245_v47, 0.0  ;;  %vm2813_vm3 = vcmp.ge.s32.totalorder %v2442_v20, 0  ;;  %v1919_v6 = vpack.c.bf16 %v1544_v5, %v1543_v4  ;;  %v1679_v7 = vld [vmem:[%s2781_s8] ss:$0 sm:$0xff] }
 0x45f   :  { %1310 = vrot.lane.b32.xlu0 %v1236_v56, %s1945_s19  ;;  %v1248_v35 = vsel %vm2813_vm3, %v1243_v19, 0.0  ;;  %vm1654_vm7 = vcmask 7168  }
 0x460   :  { %1920 = vmatprep.subr.bf16.mxu1 %v1919_v6 }
 0x461   :  { %1922 = vmatpush3.bf16.msra.mxu1 %v1919_v6 }
 0x462   :  { %1328 = vrot.lane.b32.xlu1 %v1273_v36, %s1946_s20  ;;  %1845 = vmatprep.subr.mxu1 %v1545_v57 }
 0x463   :  { %1290 = vrot.lane.b32.xlu0 %v1258_v22, %s1943_s17 }
 0x465   :  { %1846 = vmatpush3.msra.mxu1 %v1545_v57 }
 0x466   :  { %1324 = vrot.lane.b32.xlu1 %v1271_v16, %s1946_s20 }
 0x467   :  { %1326 = vrot.lane.b32.xlu0 %v1266_v15, %s1946_s20 }
 0x46a   :  { %1294 = vrot.lane.b32.xlu1 %v1260_v31, %s1943_s17  ;;  %v16_v31 = vstv %s2782_s10 }
 0x46b   :  { %1340 = vrot.lane.b32.xlu0 %v1283_v24, %s1942_s16  ;;  %17 = vst [vmem:[#allocation2] sm:$0x1] %v16_v31 }
 0x46e   :  { %1344 = vrot.lane.b32.xlu1 %v1285_v38, %s1942_s16 }
 0x46f   :  { %1342 = vrot.lane.b32.xlu0 %v1278_v51, %s1942_s16 }
 0x4c4   :  { %v1309_v37 = vpop.permute.xlu1 %1308 }
 0x4c5   :  { %v1307_v33 = vpop.permute.xlu0 %1306 }
 0x4c8   :  { %v1293_v41 = vpop.permute.xlu1 %1292 }
 0x4c9   :  { %v1323_v25 = vpop.permute.xlu0 %1322  ;;  %v1351_v46 = vsel %vm881_vm6, %v2616_v50, %v1293_v41 }
 0x4ca   :  { %v1355_v48 = vsel %vm886_vm8, %v1351_v46, %v1309_v37 }
 0x4cc   :  { %v1313_v42 = vpop.permute.xlu1 %1312 }
 0x4cd   :  { %v1339_v23 = vpop.permute.xlu0 %1338 }
 0x4d0   :  { %v1297_v40 = vpop.permute.xlu1 %1296 }
 0x4d1   :  { %v1311_v43 = vpop.permute.xlu0 %1310  ;;  %v1353_v62 = vsel %vm881_vm6, %v1242_v10, %v1297_v40 }
 0x4d2   :  { %v1357_v1 = vsel %vm886_vm8, %v1353_v62, %v1313_v42 }
 0x4d4   :  { %v1329_v44 = vpop.permute.xlu1 %1328 }
 0x4d5   :  { %v1291_v2 = vpop.permute.xlu0 %1290  ;;  %v1361_v50 = vsel %vm891_vm13, %v1357_v1, %v1329_v44 }
 0x4d6   :  { %v1350_v39 = vsel %vm881_vm6, %v1246_v26, %v1291_v2 }
 0x4d7   :  { %v1354_v34 = vsel %vm886_vm8, %v1350_v39, %v1307_v33 }
 0x4d8   :  { %v1325_v60 = vpop.permute.xlu1 %1324  ;;  %v1358_v45 = vsel %vm891_vm13, %v1354_v34, %v1323_v25 }
 0x4d9   :  { %v1327_v61 = vpop.permute.xlu0 %1326  ;;  %v1362_v11 = vsel %vm896_vm15, %v1358_v45, %v1339_v23  ;;  %v1359_v52 = vsel %vm891_vm13, %v1355_v48, %v1325_v60 }
 0x4da   :  { %1835 = vmatprep.mubr.msk.f32.mxu0 %vm901_vm14, %v1362_v11 }
 0x4dc   :  { %v1295_v49 = vpop.permute.xlu1 %1294 }
 0x4dd   :  { %v1352_v55 = vsel %vm881_vm6, %v1248_v35, %v1295_v49  ;;  %v1341_v56 = vpop.permute.xlu0 %1340 }
 0x4de   :  { %v1356_v63 = vsel %vm886_vm8, %v1352_v55, %v1311_v43  ;;  %v1363_v54 = vsel %vm896_vm15, %v1359_v52, %v1341_v56 }
 0x4df   :  { %1836 = vmatmul.mubr.msk.f32.vlgmr.msra.gmra.mrb[4].mxu0 %vm901_vm14, %v1363_v54  ;;  %v1360_v20 = vsel %vm891_vm13, %v1356_v63, %v1327_v61  ;;  %v1684_v63 = vld [vmem:[#allocation2] ss:$0 sm:$0xff] }
 0x4e0   :  { %v1345_v0 = vpop.permute.xlu1 %1344 }
 0x4e1   :  { %v1343_v32 = vpop.permute.xlu0 %1342  ;;  %v1365_v3 = vsel %vm896_vm15, %v1361_v50, %v1345_v0 }
 0x4e2   :  { %v1364_v27 = vsel %vm896_vm15, %v1360_v20, %v1343_v32  ;;  %vm2814_vm15 = vmmov %vm2808_vm4 }
 0x4e3   :  { %1838 = vmatprep.mubr.msk.f32.mxu0 %vm901_vm14, %v1364_v27 }
 0x4e4   :  { %1839 = vmatmul.mubr.msk.f32.gmra.mrb[6].mxu0 %vm901_vm14, %v1365_v3  ;;  %vm2815_vm14 = vmmov %vm2806_vm11 }
 0x5b2   :  { %v1837_v59 = vpop.f32.mrb[4].mxu0 }
 0x5b3   :  { %v1462_v8 = vadd.f32 %v1837_v59, %v1679_v7  ;;  %v1456_v12 = vpop.f32.mrb[5].mxu0 }
 0x5b4   :  { %v1457_v13 = vadd.f32 %v1679_v7, %v1456_v12 }
 0x5b5   :  { %v1476_v14 = vmax.f32 %v1462_v8, 0.0 }
 0x5b6   :  { %v1475_v15 = vmax.f32 %v1457_v13, 0.0 }
 0x5b7   :  { %v1480_v17 = vrot.slane %v1476_v14, 7  ;;  %v1492_v18 = vrot.slane %v1476_v14, 1  ;;  %1509 = vrot.lane.b32.xlu1 %v1476_v14, %s1943_s17  ;;  %v1840_v51 = vpop.f32.mrb[6].mxu0 }
 0x5b8   :  { %v1479_v10 = vrot.slane %v1475_v15, 7  ;;  %v1491_v47 = vrot.slane %v1475_v15, 1  ;;  %v1472_v21 = vadd.f32 %v1840_v51, %v1679_v7  ;;  %v1466_v19 = vpop.f32.mrb[7].mxu0  ;;  %1507 = vrot.lane.b32.xlu0 %v1475_v15, %s1943_s17 }
 0x5b9   :  { %v1467_v28 = vadd.f32 %v1679_v7, %v1466_v19 }
 0x5ba   :  { %v1478_v36 = vmax.f32 %v1472_v21, 0.0  ;;  %v1497_v22 = vsel %vm138_vm0, %v1491_v47, %v1492_v18  ;;  %v1485_v16 = vsel %vm101_vm1, %v1479_v10, %v1480_v17 }
 0x5bb   :  { %v1477_v24 = vmax.f32 %v1467_v28, 0.0 }
 0x5bc   :  { %v1482_v38 = vrot.slane %v1478_v36, 7  ;;  %v1494_v37 = vrot.slane %v1478_v36, 1  ;;  %1513 = vrot.lane.b32.xlu1 %v1478_v36, %s1943_s17  ;;  %1523 = vrot.lane.b32.xlu0 %v1497_v22, %s1945_s19 }
 0x5bd   :  { %v1481_v33 = vrot.slane %v1477_v24, 7  ;;  %v1493_v41 = vrot.slane %v1477_v24, 1 }
 0x5be   :  { %v1498_v25 = vsel %vm138_vm0, %v1494_v37, %v1491_v47  ;;  %v1486_v42 = vsel %vm101_vm1, %v1482_v38, %v1479_v10 }
 0x5bf   :  { %v1496_v23 = vsel %vm138_vm0, %v1492_v18, %v1493_v41  ;;  %v1495_v40 = vsel %vm138_vm0, %v1493_v41, %v1494_v37  ;;  %v1483_v44 = vsel %vm101_vm1, %v1481_v33, %v1482_v38  ;;  %v1484_v2 = vsel %vm101_vm1, %v1480_v17, %v1481_v33  ;;  %vm2816_vm0 = vmmov %vm2807_vm12 }
 0x5c0   :  { %1511 = vrot.lane.b32.xlu0 %v1477_v24, %s1943_s17  ;;  %v1500_v43 = vsel %vm2814_vm15, %v1496_v23, 0.0  ;;  %v1502_v26 = vsel %vm2815_vm14, %v1498_v25, 0.0  ;;  %v1487_v29 = vsel %vm2816_vm0, %v1486_v42, 0.0  ;;  %vm2817_vm1 = vmmov %vm2809_vm9 }
 0x5c1   :  { %1525 = vrot.lane.b32.xlu1 %v1500_v43, %s1945_s19  ;;  %v1489_v35 = vsel %vm2817_vm1, %v1484_v2, 0.0 }
 0x5c4   :  { %1527 = vrot.lane.b32.xlu0 %v1495_v40, %s1945_s19 }
 0x5c5   :  { %1529 = vrot.lane.b32.xlu1 %v1502_v26, %s1945_s19 }
 0x629   :  { %v1510_v39 = vpop.permute.xlu1 %1509 }
 0x62a   :  { %v1508_v34 = vpop.permute.xlu0 %1507  ;;  %v1536_v11 = vsel %vm881_vm6, %v1485_v16, %v1510_v39 }
 0x62b   :  { %v1535_v60 = vsel %vm881_vm6, %v1487_v29, %v1508_v34 }
 0x62e   :  { %v1514_v45 = vpop.permute.xlu1 %1513  ;;  %v1524_v46 = vpop.permute.xlu0 %1523 }
 0x62f   :  { %v1539_v9 = vsel %vm886_vm8, %v1535_v60, %v1524_v46  ;;  %v1538_v52 = vsel %vm881_vm6, %v1483_v44, %v1514_v45 }
 0x630   :  { %1847 = vmatprep.mubr.msk.f32.mxu1 %vm891_vm13, %v1539_v9 }
 0x632   :  { %v1512_v61 = vpop.permute.xlu0 %1511 }
 0x633   :  { %v1526_v30 = vpop.permute.xlu1 %1525  ;;  %v1537_v53 = vsel %vm881_vm6, %v1489_v35, %v1512_v61 }
 0x634   :  { %v1540_v48 = vsel %vm886_vm8, %v1536_v11, %v1526_v30 }
 0x635   :  { %1848 = vmatmul.mubr.msk.f32.vlgmr.msra.gmra.mrb[8].mxu1 %vm891_vm13, %v1540_v48 }
 0x636   :  { %v1528_v49 = vpop.permute.xlu0 %1527 }
 0x637   :  { %v1541_v55 = vsel %vm886_vm8, %v1537_v53, %v1528_v49  ;;  %v1530_v56 = vpop.permute.xlu1 %1529 }
 0x638   :  { %v1542_v62 = vsel %vm886_vm8, %v1538_v52, %v1530_v56  ;;  %1850 = vmatprep.mubr.msk.f32.mxu1 %vm891_vm13, %v1541_v55 }
 0x639   :  { %1851 = vmatmul.mubr.msk.f32.gmra.mrb[10].mxu1 %vm891_vm13, %v1542_v62 }
 0x708   :  { %v1849_v54 = vpop.f32.mrb[8].mxu1 }
 0x709   :  { %v1637_v58 = vadd.f32 %v1849_v54, %v1684_v63  ;;  %v1631_v0 = vpop.f32.mrb[9].mxu1 }
 0x70a   :  { %v1632_v1 = vadd.f32 %v1684_v63, %v1631_v0 }
 0x70b   :  { %v1651_v32 = vmax.f32 %v1637_v58, 0.0 }
 0x70c   :  { %v1650_v20 = vmax.f32 %v1632_v1, 0.0  ;;  %v1852_v50 = vpop.f32.mrb[10].mxu1 }
 0x70d   :  { %1656 = vst.msk [vmem:[%s2783_s11 + $0x8] sm:$0xff] %vm1654_vm7, %v1651_v32  ;;  %v1647_v27 = vadd.f32 %v1852_v50, %v1684_v63  ;;  %v1641_v3 = vpop.f32.mrb[11].mxu1 }
 0x70e   :  { %1655 = vst.msk [vmem:[%s2783_s11] sm:$0xff] %vm1654_vm7, %v1650_v20  ;;  %v1642_v4 = vadd.f32 %v1684_v63, %v1641_v3 }
 0x70f   :  { %v1653_v5 = vmax.f32 %v1647_v27, 0.0 }
 0x710   :  { %v1652_v6 = vmax.f32 %v1642_v4, 0.0 }
 0x711   :  { %1658 = vst.msk [vmem:[%s2783_s11 + $0x18] sm:$0xff] %vm1654_vm7, %v1653_v5 }
 0x712   :  { %1657 = vst.msk [vmem:[%s2783_s11 + $0x10] sm:$0xff] %vm1654_vm7, %v1652_v6 }

</bundles_post_ra>
